<compile_context>
chip_gen: v6e
topology: v6e:2x2x1
jax: 0.10.0
libtpu: 0.0.40
codegen_flags: <defaults>
</compile_context>

<pallas_src>
import math

import jax
import jax.numpy as jnp
from jax import lax
from jax.experimental import pallas as pl
from jax.experimental.pallas import tpu as pltpu

# ---- small, module-consistent sizes ----
B, S, H = 2, 8, 32          # batch, seq, hidden_size
NH, DH = 4, 8               # heads, head dim (NH * DH == H)
FFN = 64                    # intermediate size
NUM_CLASSES = 11            # from BERTClassifier(num_classes=11)
C_PAD = 128                 # lane-padded classifier output width
VOCAB, TYPE_VOCAB, MAX_POS = 100, 2, 16
LN_EPS = 1e-12

VMEM = pl.BlockSpec(memory_space=pltpu.MemorySpace.VMEM)
SMEM = pl.BlockSpec(memory_space=pltpu.MemorySpace.SMEM)


# ---------------------------- fused kernel ----------------------------

def _layernorm(x, g, b):
    mu = jnp.mean(x, axis=-1, keepdims=True)
    var = jnp.mean((x - mu) ** 2, axis=-1, keepdims=True)
    return (x - mu) * lax.rsqrt(var + LN_EPS) * g + b


def fused_bert_classifier_kernel(
        valid_ref, emb_ref,
        wqkv_ref, bqkv_ref, emb_g_ref, emb_b_ref,
        wo_ref, bo_ref, attn_g_ref, attn_b_ref,
        w1_ref, b1_ref, w2_ref, b2_ref, ffn_g_ref, ffn_b_ref,
        wp_ref, bp_ref, wc_ref, bc_ref,
        out_ref,
        ctx_ref, cls_ref):
    # ---- embedding layernorm (no fake zero residual) ----
    h = _layernorm(emb_ref[...].astype(jnp.float32), emb_g_ref[...], emb_b_ref[...])

    # ---- fused QKV projection: one [B*S, H] @ [H, 3H] matmul ----
    qkv = jnp.dot(h, wqkv_ref[...], preferred_element_type=jnp.float32) + bqkv_ref[...]

    # ---- multi-head self-attention, mask built in-kernel from SMEM valid_length ----
    scale = 1.0 / math.sqrt(DH)
    col = lax.broadcasted_iota(jnp.int32, (1, S), 1)
    for b in range(B):                                   # static unroll, B=2
        bias = jnp.where(col < valid_ref[b], 0.0, -1e9)  # [1, S] additive mask
        r0, r1 = b * S, (b + 1) * S
        for hd in range(NH):                             # static unroll, NH=4
            q0 = hd * DH
            k0 = H + hd * DH
            v0 = 2 * H + hd * DH
            qh = qkv[r0:r1, q0:q0 + DH]
            kh = qkv[r0:r1, k0:k0 + DH]
            vh = qkv[r0:r1, v0:v0 + DH]
            s = jnp.dot(qh, kh.T, preferred_element_type=jnp.float32) * scale + bias
            m = jnp.max(s, axis=-1, keepdims=True)
            p = jnp.exp(s - m)
            p = p * pl.reciprocal(jnp.sum(p, axis=-1, keepdims=True), approx=True)
            ctx_ref[r0:r1, hd * DH:(hd + 1) * DH] = jnp.dot(
                p, vh, preferred_element_type=jnp.float32)

    # ---- attention output projection + residual + LN ----
    attn_out = jnp.dot(ctx_ref[...], wo_ref[...],
                       preferred_element_type=jnp.float32) + bo_ref[...]
    h = _layernorm(attn_out + h, attn_g_ref[...], attn_b_ref[...])

    # ---- feed-forward + residual + LN ----
    ff = jnp.dot(h, w1_ref[...], preferred_element_type=jnp.float32) + b1_ref[...]
    # TODO(synk): KoBERT uses exact erf-GELU; tanh approximation kept here (small drift).
    ff = jax.nn.gelu(ff, approximate=True)
    ff = jnp.dot(ff, w2_ref[...], preferred_element_type=jnp.float32) + b2_ref[...]
    h = _layernorm(ff + h, ffn_g_ref[...], ffn_b_ref[...])

    # ---- pooler (tanh Linear on [CLS] rows) fused with classifier ----
    for b in range(B):
        cls_ref[b:b + 1, :] = h[b * S:b * S + 1, :]
    pooled = jnp.tanh(jnp.dot(cls_ref[...], wp_ref[...],
                              preferred_element_type=jnp.float32) + bp_ref[...])
    # TODO(synk): nn.Dropout(p=dr_rate) is identity in eval mode; not applied here.
    out_ref[...] = jnp.dot(pooled, wc_ref[...],
                           preferred_element_type=jnp.float32) + bc_ref[...]


# ---------------------------- parameters ----------------------------

def init_params(key):
    ks = jax.random.split(key, 16)
    w = lambda k, shape: 0.02 * jax.random.normal(k, shape, jnp.float32)
    z = lambda *shape: jnp.zeros(shape, jnp.float32)
    o = lambda *shape: jnp.ones(shape, jnp.float32)

    wq, wk, wv = w(ks[3], (H, H)), w(ks[4], (H, H)), w(ks[5], (H, H))
    w_cls = w(ks[10], (H, NUM_CLASSES))
    return dict(
        word_emb=w(ks[0], (VOCAB, H)),
        pos_emb=w(ks[1], (MAX_POS, H)),
        seg_emb=w(ks[2], (TYPE_VOCAB, H)),
        emb_ln_g=o(1, H), emb_ln_b=z(1, H),
        # fused QKV: [H, 3H] weight, [1, 3H] bias  (q | k | v)
        wqkv=jnp.concatenate([wq, wk, wv], axis=1),
        bqkv=z(1, 3 * H),
        wo=w(ks[6], (H, H)), bo=z(1, H),
        attn_ln_g=o(1, H), attn_ln_b=z(1, H),
        w_ffn1=w(ks[7], (H, FFN)), b_ffn1=z(1, FFN),
        w_ffn2=w(ks[8], (FFN, H)), b_ffn2=z(1, H),
        ffn_ln_g=o(1, H), ffn_ln_b=z(1, H),
        w_pool=w(ks[9], (H, H)), b_pool=z(1, H),
        # classifier lane-padded to 128 output columns (sliced back in the wrapper)
        w_cls_pad=jnp.pad(w_cls, ((0, 0), (0, C_PAD - NUM_CLASSES))),
        b_cls_pad=z(1, C_PAD),
    )


# ---------------------------- forward pass ----------------------------

@jax.jit
def bert_classifier_forward(params, token_ids, valid_length, segment_ids):
    # Embedding gathers are data-dependent lookups -> plain-JAX glue.
    emb = (jnp.take(params["word_emb"], token_ids, axis=0)
           + params["pos_emb"][:S][None, :, :]
           + jnp.take(params["seg_emb"], segment_ids, axis=0)).reshape(B * S, H)

    logits_pad = pl.pallas_call(
        fused_bert_classifier_kernel,
        out_shape=jax.ShapeDtypeStruct((B, C_PAD), jnp.float32),
        in_specs=[SMEM] + [VMEM] * 19,
        out_specs=VMEM,
        scratch_shapes=[pltpu.VMEM((B * S, H), jnp.float32),   # attention context
                        pltpu.VMEM((B, H), jnp.float32)],      # [CLS] rows
    )(valid_length.astype(jnp.int32),
      emb,
      params["wqkv"], params["bqkv"], params["emb_ln_g"], params["emb_ln_b"],
      params["wo"], params["bo"], params["attn_ln_g"], params["attn_ln_b"],
      params["w_ffn1"], params["b_ffn1"], params["w_ffn2"], params["b_ffn2"],
      params["ffn_ln_g"], params["ffn_ln_b"],
      params["w_pool"], params["b_pool"], params["w_cls_pad"], params["b_cls_pad"])

    return logits_pad[:, :NUM_CLASSES]


# ---------------------------- main ----------------------------

if __name__ == "__main__":
    key = jax.random.PRNGKey(0)
    pkey, tkey = jax.random.split(key)
    params = init_params(pkey)

    token_ids = jax.random.randint(tkey, (B, S), 0, VOCAB, dtype=jnp.int32)
    valid_length = jnp.array([5, 8], dtype=jnp.int32)
    segment_ids = jnp.zeros((B, S), dtype=jnp.int32)

    logits = bert_classifier_forward(params, token_ids, valid_length, segment_ids)
    jax.block_until_ready(logits)
    assert logits.shape == (B, NUM_CLASSES)
    print("KERNEL_OK")
</pallas_src>

<mosaic_0001>
module attributes {stable_mosaic.version = 11 : i64} {
  func.func @fused_bert_classifier_kernel(%arg0: memref<2xi32, #tpu.memory_space<smem>>, %arg1: memref<16x32xf32, #tpu.memory_space<vmem>>, %arg2: memref<32x96xf32, #tpu.memory_space<vmem>>, %arg3: memref<1x96xf32, #tpu.memory_space<vmem>>, %arg4: memref<1x32xf32, #tpu.memory_space<vmem>>, %arg5: memref<1x32xf32, #tpu.memory_space<vmem>>, %arg6: memref<32x32xf32, #tpu.memory_space<vmem>>, %arg7: memref<1x32xf32, #tpu.memory_space<vmem>>, %arg8: memref<1x32xf32, #tpu.memory_space<vmem>>, %arg9: memref<1x32xf32, #tpu.memory_space<vmem>>, %arg10: memref<32x64xf32, #tpu.memory_space<vmem>>, %arg11: memref<1x64xf32, #tpu.memory_space<vmem>>, %arg12: memref<64x32xf32, #tpu.memory_space<vmem>>, %arg13: memref<1x32xf32, #tpu.memory_space<vmem>>, %arg14: memref<1x32xf32, #tpu.memory_space<vmem>>, %arg15: memref<1x32xf32, #tpu.memory_space<vmem>>, %arg16: memref<32x32xf32, #tpu.memory_space<vmem>>, %arg17: memref<1x32xf32, #tpu.memory_space<vmem>>, %arg18: memref<32x128xf32, #tpu.memory_space<vmem>>, %arg19: memref<1x128xf32, #tpu.memory_space<vmem>>, %arg20: memref<2x128xf32, #tpu.memory_space<vmem>>, %arg21: memref<16x32xf32, #tpu.memory_space<vmem>>, %arg22: memref<2x32xf32, #tpu.memory_space<vmem>>) attributes {dimension_semantics = [], scalar_prefetch = 0 : i64, scratch_operands = 2 : i64, tpu.core_type = #tpu.core_type<tc>} {
    %c0 = arith.constant 0 : index
    %c0_0 = arith.constant 0 : index
    %0 = vector.load %arg1[%c0, %c0_0] : memref<16x32xf32, #tpu.memory_space<vmem>>, vector<16x32xf32>
    %c0_1 = arith.constant 0 : index
    %c0_2 = arith.constant 0 : index
    %1 = vector.load %arg4[%c0_1, %c0_2] : memref<1x32xf32, #tpu.memory_space<vmem>>, vector<1x32xf32>
    %c0_3 = arith.constant 0 : index
    %c0_4 = arith.constant 0 : index
    %2 = vector.load %arg5[%c0_3, %c0_4] : memref<1x32xf32, #tpu.memory_space<vmem>>, vector<1x32xf32>
    %cst = arith.constant dense<0.000000e+00> : vector<16xf32>
    %3 = vector.multi_reduction <add>, %0, %cst [1] : vector<16x32xf32> to vector<16xf32>
    %4 = vector.shape_cast %3 : vector<16xf32> to vector<16x1xf32>
    %cst_5 = arith.constant 3.200000e+01 : f32
    %5 = vector.broadcast %cst_5 : f32 to vector<16x1xf32>
    %6 = arith.divf %4, %5 : vector<16x1xf32>
    %7 = vector.broadcast %6 : vector<16x1xf32> to vector<16x32xf32>
    %8 = arith.subf %0, %7 : vector<16x32xf32>
    %9 = arith.mulf %8, %8 : vector<16x32xf32>
    %cst_6 = arith.constant dense<0.000000e+00> : vector<16xf32>
    %10 = vector.multi_reduction <add>, %9, %cst_6 [1] : vector<16x32xf32> to vector<16xf32>
    %11 = vector.shape_cast %10 : vector<16xf32> to vector<16x1xf32>
    %cst_7 = arith.constant 3.200000e+01 : f32
    %12 = vector.broadcast %cst_7 : f32 to vector<16x1xf32>
    %13 = arith.divf %11, %12 : vector<16x1xf32>
    %14 = vector.broadcast %6 : vector<16x1xf32> to vector<16x32xf32>
    %15 = arith.subf %0, %14 : vector<16x32xf32>
    %cst_8 = arith.constant 9.99999996E-13 : f32
    %16 = vector.broadcast %cst_8 : f32 to vector<16x1xf32>
    %17 = arith.addf %13, %16 : vector<16x1xf32>
    %18 = math.rsqrt %17 : vector<16x1xf32>
    %19 = vector.broadcast %18 : vector<16x1xf32> to vector<16x32xf32>
    %20 = arith.mulf %15, %19 : vector<16x32xf32>
    %21 = vector.broadcast %1 : vector<1x32xf32> to vector<16x32xf32>
    %22 = arith.mulf %20, %21 : vector<16x32xf32>
    %23 = vector.broadcast %2 : vector<1x32xf32> to vector<16x32xf32>
    %24 = arith.addf %22, %23 : vector<16x32xf32>
    %c0_9 = arith.constant 0 : index
    %c0_10 = arith.constant 0 : index
    %25 = vector.load %arg2[%c0_9, %c0_10] : memref<32x96xf32, #tpu.memory_space<vmem>>, vector<32x96xf32>
    %cst_11 = arith.constant dense<0.000000e+00> : vector<16x96xf32>
    %26 = tpu.matmul %24, %25, %cst_11 {dimension_numbers = #tpu.dot_dimension_numbers<[1], [0], [0], [1], [0, 0, 1, 1], [], []>} : vector<16x32xf32>, vector<32x96xf32>, vector<16x96xf32> -> vector<16x96xf32>
    %c0_12 = arith.constant 0 : index
    %c0_13 = arith.constant 0 : index
    %27 = vector.load %arg3[%c0_12, %c0_13] : memref<1x96xf32, #tpu.memory_space<vmem>>, vector<1x96xf32>
    %28 = vector.broadcast %27 : vector<1x96xf32> to vector<16x96xf32>
    %29 = arith.addf %26, %28 : vector<16x96xf32>
    %30 = tpu.iota {dimensions = array<i32: 1>} : vector<1x8xi32>
    %c0_14 = arith.constant 0 : index
    %31 = memref.load %arg0[%c0_14] : memref<2xi32, #tpu.memory_space<smem>>
    %32 = vector.broadcast %31 : i32 to vector<1x8xi32>
    %33 = arith.cmpi slt, %30, %32 : vector<1x8xi32>
    %cst_15 = arith.constant 0.000000e+00 : f32
    %cst_16 = arith.constant -1.000000e+09 : f32
    %34 = vector.broadcast %cst_15 : f32 to vector<1x8xf32>
    %35 = vector.broadcast %cst_16 : f32 to vector<1x8xf32>
    %36 = arith.select %33, %34, %35 : vector<1x8xi1>, vector<1x8xf32>
    %37 = vector.extract_strided_slice %29 {offsets = [0, 0], sizes = [8, 8], strides = [1, 1]} : vector<16x96xf32> to vector<8x8xf32>
    %38 = vector.extract_strided_slice %29 {offsets = [0, 32], sizes = [8, 8], strides = [1, 1]} : vector<16x96xf32> to vector<8x8xf32>
    %39 = vector.extract_strided_slice %29 {offsets = [0, 64], sizes = [8, 8], strides = [1, 1]} : vector<16x96xf32> to vector<8x8xf32>
    %40 = tpu.transpose %38, [1, 0] : vector<8x8xf32> -> vector<8x8xf32>
    %cst_17 = arith.constant dense<0.000000e+00> : vector<8x8xf32>
    %41 = tpu.matmul %37, %40, %cst_17 {dimension_numbers = #tpu.dot_dimension_numbers<[1], [0], [0], [1], [0, 0, 1, 1], [], []>} : vector<8x8xf32>, vector<8x8xf32>, vector<8x8xf32> -> vector<8x8xf32>
    %cst_18 = arith.constant 0.353553385 : f32
    %42 = vector.broadcast %cst_18 : f32 to vector<8x8xf32>
    %43 = arith.mulf %41, %42 : vector<8x8xf32>
    %44 = vector.broadcast %36 : vector<1x8xf32> to vector<8x8xf32>
    %45 = arith.addf %43, %44 : vector<8x8xf32>
    %cst_19 = arith.constant dense<0xFF800000> : vector<8xf32>
    %46 = vector.multi_reduction <maximumf>, %45, %cst_19 [1] : vector<8x8xf32> to vector<8xf32>
    %47 = vector.shape_cast %46 : vector<8xf32> to vector<8x1xf32>
    %48 = vector.broadcast %47 : vector<8x1xf32> to vector<8x8xf32>
    %49 = arith.subf %45, %48 : vector<8x8xf32>
    %50 = math.exp %49 : vector<8x8xf32>
    %cst_20 = arith.constant dense<0.000000e+00> : vector<8xf32>
    %51 = vector.multi_reduction <add>, %50, %cst_20 [1] : vector<8x8xf32> to vector<8xf32>
    %52 = vector.shape_cast %51 : vector<8xf32> to vector<8x1xf32>
    %53 = tpu.reciprocal %52 {approx = true} : vector<8x1xf32> -> vector<8x1xf32>
    %54 = vector.broadcast %53 : vector<8x1xf32> to vector<8x8xf32>
    %55 = arith.mulf %50, %54 : vector<8x8xf32>
    %cst_21 = arith.constant dense<0.000000e+00> : vector<8x8xf32>
    %56 = tpu.matmul %55, %39, %cst_21 {dimension_numbers = #tpu.dot_dimension_numbers<[1], [0], [0], [1], [0, 0, 1, 1], [], []>} : vector<8x8xf32>, vector<8x8xf32>, vector<8x8xf32> -> vector<8x8xf32>
    %c0_22 = arith.constant 0 : index
    %c0_23 = arith.constant 0 : index
    %57 = vector.load %arg21[%c0_22, %c0_23] : memref<16x32xf32, #tpu.memory_space<vmem>>, vector<8x8xf32>
    tpu.vector_store %arg21[%c0_22, %c0_23], %56 {strides = array<i32>} : memref<16x32xf32, #tpu.memory_space<vmem>>, vector<8x8xf32>,
    %58 = vector.extract_strided_slice %29 {offsets = [0, 8], sizes = [8, 8], strides = [1, 1]} : vector<16x96xf32> to vector<8x8xf32>
    %59 = vector.extract_strided_slice %29 {offsets = [0, 40], sizes = [8, 8], strides = [1, 1]} : vector<16x96xf32> to vector<8x8xf32>
    %60 = vector.extract_strided_slice %29 {offsets = [0, 72], sizes = [8, 8], strides = [1, 1]} : vector<16x96xf32> to vector<8x8xf32>
    %61 = tpu.transpose %59, [1, 0] : vector<8x8xf32> -> vector<8x8xf32>
    %cst_24 = arith.constant dense<0.000000e+00> : vector<8x8xf32>
    %62 = tpu.matmul %58, %61, %cst_24 {dimension_numbers = #tpu.dot_dimension_numbers<[1], [0], [0], [1], [0, 0, 1, 1], [], []>} : vector<8x8xf32>, vector<8x8xf32>, vector<8x8xf32> -> vector<8x8xf32>
    %cst_25 = arith.constant 0.353553385 : f32
    %63 = vector.broadcast %cst_25 : f32 to vector<8x8xf32>
    %64 = arith.mulf %62, %63 : vector<8x8xf32>
    %65 = vector.broadcast %36 : vector<1x8xf32> to vector<8x8xf32>
    %66 = arith.addf %64, %65 : vector<8x8xf32>
    %cst_26 = arith.constant dense<0xFF800000> : vector<8xf32>
    %67 = vector.multi_reduction <maximumf>, %66, %cst_26 [1] : vector<8x8xf32> to vector<8xf32>
    %68 = vector.shape_cast %67 : vector<8xf32> to vector<8x1xf32>
    %69 = vector.broadcast %68 : vector<8x1xf32> to vector<8x8xf32>
    %70 = arith.subf %66, %69 : vector<8x8xf32>
    %71 = math.exp %70 : vector<8x8xf32>
    %cst_27 = arith.constant dense<0.000000e+00> : vector<8xf32>
    %72 = vector.multi_reduction <add>, %71, %cst_27 [1] : vector<8x8xf32> to vector<8xf32>
    %73 = vector.shape_cast %72 : vector<8xf32> to vector<8x1xf32>
    %74 = tpu.reciprocal %73 {approx = true} : vector<8x1xf32> -> vector<8x1xf32>
    %75 = vector.broadcast %74 : vector<8x1xf32> to vector<8x8xf32>
    %76 = arith.mulf %71, %75 : vector<8x8xf32>
    %cst_28 = arith.constant dense<0.000000e+00> : vector<8x8xf32>
    %77 = tpu.matmul %76, %60, %cst_28 {dimension_numbers = #tpu.dot_dimension_numbers<[1], [0], [0], [1], [0, 0, 1, 1], [], []>} : vector<8x8xf32>, vector<8x8xf32>, vector<8x8xf32> -> vector<8x8xf32>
    %c0_29 = arith.constant 0 : index
    %c8 = arith.constant 8 : index
    %78 = vector.load %arg21[%c0_29, %c8] : memref<16x32xf32, #tpu.memory_space<vmem>>, vector<8x8xf32>
    tpu.vector_store %arg21[%c0_29, %c8], %77 {strides = array<i32>} : memref<16x32xf32, #tpu.memory_space<vmem>>, vector<8x8xf32>,
    %79 = vector.extract_strided_slice %29 {offsets = [0, 16], sizes = [8, 8], strides = [1, 1]} : vector<16x96xf32> to vector<8x8xf32>
    %80 = vector.extract_strided_slice %29 {offsets = [0, 48], sizes = [8, 8], strides = [1, 1]} : vector<16x96xf32> to vector<8x8xf32>
    %81 = vector.extract_strided_slice %29 {offsets = [0, 80], sizes = [8, 8], strides = [1, 1]} : vector<16x96xf32> to vector<8x8xf32>
    %82 = tpu.transpose %80, [1, 0] : vector<8x8xf32> -> vector<8x8xf32>
    %cst_30 = arith.constant dense<0.000000e+00> : vector<8x8xf32>
    %83 = tpu.matmul %79, %82, %cst_30 {dimension_numbers = #tpu.dot_dimension_numbers<[1], [0], [0], [1], [0, 0, 1, 1], [], []>} : vector<8x8xf32>, vector<8x8xf32>, vector<8x8xf32> -> vector<8x8xf32>
    %cst_31 = arith.constant 0.353553385 : f32
    %84 = vector.broadcast %cst_31 : f32 to vector<8x8xf32>
    %85 = arith.mulf %83, %84 : vector<8x8xf32>
    %86 = vector.broadcast %36 : vector<1x8xf32> to vector<8x8xf32>
    %87 = arith.addf %85, %86 : vector<8x8xf32>
    %cst_32 = arith.constant dense<0xFF800000> : vector<8xf32>
    %88 = vector.multi_reduction <maximumf>, %87, %cst_32 [1] : vector<8x8xf32> to vector<8xf32>
    %89 = vector.shape_cast %88 : vector<8xf32> to vector<8x1xf32>
    %90 = vector.broadcast %89 : vector<8x1xf32> to vector<8x8xf32>
    %91 = arith.subf %87, %90 : vector<8x8xf32>
    %92 = math.exp %91 : vector<8x8xf32>
    %cst_33 = arith.constant dense<0.000000e+00> : vector<8xf32>
    %93 = vector.multi_reduction <add>, %92, %cst_33 [1] : vector<8x8xf32> to vector<8xf32>
    %94 = vector.shape_cast %93 : vector<8xf32> to vector<8x1xf32>
    %95 = tpu.reciprocal %94 {approx = true} : vector<8x1xf32> -> vector<8x1xf32>
    %96 = vector.broadcast %95 : vector<8x1xf32> to vector<8x8xf32>
    %97 = arith.mulf %92, %96 : vector<8x8xf32>
    %cst_34 = arith.constant dense<0.000000e+00> : vector<8x8xf32>
    %98 = tpu.matmul %97, %81, %cst_34 {dimension_numbers = #tpu.dot_dimension_numbers<[1], [0], [0], [1], [0, 0, 1, 1], [], []>} : vector<8x8xf32>, vector<8x8xf32>, vector<8x8xf32> -> vector<8x8xf32>
    %c0_35 = arith.constant 0 : index
    %c16 = arith.constant 16 : index
    %99 = vector.load %arg21[%c0_35, %c16] : memref<16x32xf32, #tpu.memory_space<vmem>>, vector<8x8xf32>
    tpu.vector_store %arg21[%c0_35, %c16], %98 {strides = array<i32>} : memref<16x32xf32, #tpu.memory_space<vmem>>, vector<8x8xf32>,
    %100 = vector.extract_strided_slice %29 {offsets = [0, 24], sizes = [8, 8], strides = [1, 1]} : vector<16x96xf32> to vector<8x8xf32>
    %101 = vector.extract_strided_slice %29 {offsets = [0, 56], sizes = [8, 8], strides = [1, 1]} : vector<16x96xf32> to vector<8x8xf32>
    %102 = vector.extract_strided_slice %29 {offsets = [0, 88], sizes = [8, 8], strides = [1, 1]} : vector<16x96xf32> to vector<8x8xf32>
    %103 = tpu.transpose %101, [1, 0] : vector<8x8xf32> -> vector<8x8xf32>
    %cst_36 = arith.constant dense<0.000000e+00> : vector<8x8xf32>
    %104 = tpu.matmul %100, %103, %cst_36 {dimension_numbers = #tpu.dot_dimension_numbers<[1], [0], [0], [1], [0, 0, 1, 1], [], []>} : vector<8x8xf32>, vector<8x8xf32>, vector<8x8xf32> -> vector<8x8xf32>
    %cst_37 = arith.constant 0.353553385 : f32
    %105 = vector.broadcast %cst_37 : f32 to vector<8x8xf32>
    %106 = arith.mulf %104, %105 : vector<8x8xf32>
    %107 = vector.broadcast %36 : vector<1x8xf32> to vector<8x8xf32>
    %108 = arith.addf %106, %107 : vector<8x8xf32>
    %cst_38 = arith.constant dense<0xFF800000> : vector<8xf32>
    %109 = vector.multi_reduction <maximumf>, %108, %cst_38 [1] : vector<8x8xf32> to vector<8xf32>
    %110 = vector.shape_cast %109 : vector<8xf32> to vector<8x1xf32>
    %111 = vector.broadcast %110 : vector<8x1xf32> to vector<8x8xf32>
    %112 = arith.subf %108, %111 : vector<8x8xf32>
    %113 = math.exp %112 : vector<8x8xf32>
    %cst_39 = arith.constant dense<0.000000e+00> : vector<8xf32>
    %114 = vector.multi_reduction <add>, %113, %cst_39 [1] : vector<8x8xf32> to vector<8xf32>
    %115 = vector.shape_cast %114 : vector<8xf32> to vector<8x1xf32>
    %116 = tpu.reciprocal %115 {approx = true} : vector<8x1xf32> -> vector<8x1xf32>
    %117 = vector.broadcast %116 : vector<8x1xf32> to vector<8x8xf32>
    %118 = arith.mulf %113, %117 : vector<8x8xf32>
    %cst_40 = arith.constant dense<0.000000e+00> : vector<8x8xf32>
    %119 = tpu.matmul %118, %102, %cst_40 {dimension_numbers = #tpu.dot_dimension_numbers<[1], [0], [0], [1], [0, 0, 1, 1], [], []>} : vector<8x8xf32>, vector<8x8xf32>, vector<8x8xf32> -> vector<8x8xf32>
    %c0_41 = arith.constant 0 : index
    %c24 = arith.constant 24 : index
    %120 = vector.load %arg21[%c0_41, %c24] : memref<16x32xf32, #tpu.memory_space<vmem>>, vector<8x8xf32>
    tpu.vector_store %arg21[%c0_41, %c24], %119 {strides = array<i32>} : memref<16x32xf32, #tpu.memory_space<vmem>>, vector<8x8xf32>,
    %c1 = arith.constant 1 : index
    %121 = memref.load %arg0[%c1] : memref<2xi32, #tpu.memory_space<smem>>
    %122 = vector.broadcast %121 : i32 to vector<1x8xi32>
    %123 = arith.cmpi slt, %30, %122 : vector<1x8xi32>
    %cst_42 = arith.constant 0.000000e+00 : f32
    %cst_43 = arith.constant -1.000000e+09 : f32
    %124 = vector.broadcast %cst_42 : f32 to vector<1x8xf32>
    %125 = vector.broadcast %cst_43 : f32 to vector<1x8xf32>
    %126 = arith.select %123, %124, %125 : vector<1x8xi1>, vector<1x8xf32>
    %127 = vector.extract_strided_slice %29 {offsets = [8, 0], sizes = [8, 8], strides = [1, 1]} : vector<16x96xf32> to vector<8x8xf32>
    %128 = vector.extract_strided_slice %29 {offsets = [8, 32], sizes = [8, 8], strides = [1, 1]} : vector<16x96xf32> to vector<8x8xf32>
    %129 = vector.extract_strided_slice %29 {offsets = [8, 64], sizes = [8, 8], strides = [1, 1]} : vector<16x96xf32> to vector<8x8xf32>
    %130 = tpu.transpose %128, [1, 0] : vector<8x8xf32> -> vector<8x8xf32>
    %cst_44 = arith.constant dense<0.000000e+00> : vector<8x8xf32>
    %131 = tpu.matmul %127, %130, %cst_44 {dimension_numbers = #tpu.dot_dimension_numbers<[1], [0], [0], [1], [0, 0, 1, 1], [], []>} : vector<8x8xf32>, vector<8x8xf32>, vector<8x8xf32> -> vector<8x8xf32>
    %cst_45 = arith.constant 0.353553385 : f32
    %132 = vector.broadcast %cst_45 : f32 to vector<8x8xf32>
    %133 = arith.mulf %131, %132 : vector<8x8xf32>
    %134 = vector.broadcast %126 : vector<1x8xf32> to vector<8x8xf32>
    %135 = arith.addf %133, %134 : vector<8x8xf32>
    %cst_46 = arith.constant dense<0xFF800000> : vector<8xf32>
    %136 = vector.multi_reduction <maximumf>, %135, %cst_46 [1] : vector<8x8xf32> to vector<8xf32>
    %137 = vector.shape_cast %136 : vector<8xf32> to vector<8x1xf32>
    %138 = vector.broadcast %137 : vector<8x1xf32> to vector<8x8xf32>
    %139 = arith.subf %135, %138 : vector<8x8xf32>
    %140 = math.exp %139 : vector<8x8xf32>
    %cst_47 = arith.constant dense<0.000000e+00> : vector<8xf32>
    %141 = vector.multi_reduction <add>, %140, %cst_47 [1] : vector<8x8xf32> to vector<8xf32>
    %142 = vector.shape_cast %141 : vector<8xf32> to vector<8x1xf32>
    %143 = tpu.reciprocal %142 {approx = true} : vector<8x1xf32> -> vector<8x1xf32>
    %144 = vector.broadcast %143 : vector<8x1xf32> to vector<8x8xf32>
    %145 = arith.mulf %140, %144 : vector<8x8xf32>
    %cst_48 = arith.constant dense<0.000000e+00> : vector<8x8xf32>
    %146 = tpu.matmul %145, %129, %cst_48 {dimension_numbers = #tpu.dot_dimension_numbers<[1], [0], [0], [1], [0, 0, 1, 1], [], []>} : vector<8x8xf32>, vector<8x8xf32>, vector<8x8xf32> -> vector<8x8xf32>
    %c8_49 = arith.constant 8 : index
    %c0_50 = arith.constant 0 : index
    %147 = vector.load %arg21[%c8_49, %c0_50] : memref<16x32xf32, #tpu.memory_space<vmem>>, vector<8x8xf32>
    tpu.vector_store %arg21[%c8_49, %c0_50], %146 {strides = array<i32>} : memref<16x32xf32, #tpu.memory_space<vmem>>, vector<8x8xf32>,
    %148 = vector.extract_strided_slice %29 {offsets = [8, 8], sizes = [8, 8], strides = [1, 1]} : vector<16x96xf32> to vector<8x8xf32>
    %149 = vector.extract_strided_slice %29 {offsets = [8, 40], sizes = [8, 8], strides = [1, 1]} : vector<16x96xf32> to vector<8x8xf32>
    %150 = vector.extract_strided_slice %29 {offsets = [8, 72], sizes = [8, 8], strides = [1, 1]} : vector<16x96xf32> to vector<8x8xf32>
    %151 = tpu.transpose %149, [1, 0] : vector<8x8xf32> -> vector<8x8xf32>
    %cst_51 = arith.constant dense<0.000000e+00> : vector<8x8xf32>
    %152 = tpu.matmul %148, %151, %cst_51 {dimension_numbers = #tpu.dot_dimension_numbers<[1], [0], [0], [1], [0, 0, 1, 1], [], []>} : vector<8x8xf32>, vector<8x8xf32>, vector<8x8xf32> -> vector<8x8xf32>
    %cst_52 = arith.constant 0.353553385 : f32
    %153 = vector.broadcast %cst_52 : f32 to vector<8x8xf32>
    %154 = arith.mulf %152, %153 : vector<8x8xf32>
    %155 = vector.broadcast %126 : vector<1x8xf32> to vector<8x8xf32>
    %156 = arith.addf %154, %155 : vector<8x8xf32>
    %cst_53 = arith.constant dense<0xFF800000> : vector<8xf32>
    %157 = vector.multi_reduction <maximumf>, %156, %cst_53 [1] : vector<8x8xf32> to vector<8xf32>
    %158 = vector.shape_cast %157 : vector<8xf32> to vector<8x1xf32>
    %159 = vector.broadcast %158 : vector<8x1xf32> to vector<8x8xf32>
    %160 = arith.subf %156, %159 : vector<8x8xf32>
    %161 = math.exp %160 : vector<8x8xf32>
    %cst_54 = arith.constant dense<0.000000e+00> : vector<8xf32>
    %162 = vector.multi_reduction <add>, %161, %cst_54 [1] : vector<8x8xf32> to vector<8xf32>
    %163 = vector.shape_cast %162 : vector<8xf32> to vector<8x1xf32>
    %164 = tpu.reciprocal %163 {approx = true} : vector<8x1xf32> -> vector<8x1xf32>
    %165 = vector.broadcast %164 : vector<8x1xf32> to vector<8x8xf32>
    %166 = arith.mulf %161, %165 : vector<8x8xf32>
    %cst_55 = arith.constant dense<0.000000e+00> : vector<8x8xf32>
    %167 = tpu.matmul %166, %150, %cst_55 {dimension_numbers = #tpu.dot_dimension_numbers<[1], [0], [0], [1], [0, 0, 1, 1], [], []>} : vector<8x8xf32>, vector<8x8xf32>, vector<8x8xf32> -> vector<8x8xf32>
    %c8_56 = arith.constant 8 : index
    %c8_57 = arith.constant 8 : index
    %168 = vector.load %arg21[%c8_56, %c8_57] : memref<16x32xf32, #tpu.memory_space<vmem>>, vector<8x8xf32>
    tpu.vector_store %arg21[%c8_56, %c8_57], %167 {strides = array<i32>} : memref<16x32xf32, #tpu.memory_space<vmem>>, vector<8x8xf32>,
    %169 = vector.extract_strided_slice %29 {offsets = [8, 16], sizes = [8, 8], strides = [1, 1]} : vector<16x96xf32> to vector<8x8xf32>
    %170 = vector.extract_strided_slice %29 {offsets = [8, 48], sizes = [8, 8], strides = [1, 1]} : vector<16x96xf32> to vector<8x8xf32>
    %171 = vector.extract_strided_slice %29 {offsets = [8, 80], sizes = [8, 8], strides = [1, 1]} : vector<16x96xf32> to vector<8x8xf32>
    %172 = tpu.transpose %170, [1, 0] : vector<8x8xf32> -> vector<8x8xf32>
    %cst_58 = arith.constant dense<0.000000e+00> : vector<8x8xf32>
    %173 = tpu.matmul %169, %172, %cst_58 {dimension_numbers = #tpu.dot_dimension_numbers<[1], [0], [0], [1], [0, 0, 1, 1], [], []>} : vector<8x8xf32>, vector<8x8xf32>, vector<8x8xf32> -> vector<8x8xf32>
    %cst_59 = arith.constant 0.353553385 : f32
    %174 = vector.broadcast %cst_59 : f32 to vector<8x8xf32>
    %175 = arith.mulf %173, %174 : vector<8x8xf32>
    %176 = vector.broadcast %126 : vector<1x8xf32> to vector<8x8xf32>
    %177 = arith.addf %175, %176 : vector<8x8xf32>
    %cst_60 = arith.constant dense<0xFF800000> : vector<8xf32>
    %178 = vector.multi_reduction <maximumf>, %177, %cst_60 [1] : vector<8x8xf32> to vector<8xf32>
    %179 = vector.shape_cast %178 : vector<8xf32> to vector<8x1xf32>
    %180 = vector.broadcast %179 : vector<8x1xf32> to vector<8x8xf32>
    %181 = arith.subf %177, %180 : vector<8x8xf32>
    %182 = math.exp %181 : vector<8x8xf32>
    %cst_61 = arith.constant dense<0.000000e+00> : vector<8xf32>
    %183 = vector.multi_reduction <add>, %182, %cst_61 [1] : vector<8x8xf32> to vector<8xf32>
    %184 = vector.shape_cast %183 : vector<8xf32> to vector<8x1xf32>
    %185 = tpu.reciprocal %184 {approx = true} : vector<8x1xf32> -> vector<8x1xf32>
    %186 = vector.broadcast %185 : vector<8x1xf32> to vector<8x8xf32>
    %187 = arith.mulf %182, %186 : vector<8x8xf32>
    %cst_62 = arith.constant dense<0.000000e+00> : vector<8x8xf32>
    %188 = tpu.matmul %187, %171, %cst_62 {dimension_numbers = #tpu.dot_dimension_numbers<[1], [0], [0], [1], [0, 0, 1, 1], [], []>} : vector<8x8xf32>, vector<8x8xf32>, vector<8x8xf32> -> vector<8x8xf32>
    %c8_63 = arith.constant 8 : index
    %c16_64 = arith.constant 16 : index
    %189 = vector.load %arg21[%c8_63, %c16_64] : memref<16x32xf32, #tpu.memory_space<vmem>>, vector<8x8xf32>
    tpu.vector_store %arg21[%c8_63, %c16_64], %188 {strides = array<i32>} : memref<16x32xf32, #tpu.memory_space<vmem>>, vector<8x8xf32>,
    %190 = vector.extract_strided_slice %29 {offsets = [8, 24], sizes = [8, 8], strides = [1, 1]} : vector<16x96xf32> to vector<8x8xf32>
    %191 = vector.extract_strided_slice %29 {offsets = [8, 56], sizes = [8, 8], strides = [1, 1]} : vector<16x96xf32> to vector<8x8xf32>
    %192 = vector.extract_strided_slice %29 {offsets = [8, 88], sizes = [8, 8], strides = [1, 1]} : vector<16x96xf32> to vector<8x8xf32>
    %193 = tpu.transpose %191, [1, 0] : vector<8x8xf32> -> vector<8x8xf32>
    %cst_65 = arith.constant dense<0.000000e+00> : vector<8x8xf32>
    %194 = tpu.matmul %190, %193, %cst_65 {dimension_numbers = #tpu.dot_dimension_numbers<[1], [0], [0], [1], [0, 0, 1, 1], [], []>} : vector<8x8xf32>, vector<8x8xf32>, vector<8x8xf32> -> vector<8x8xf32>
    %cst_66 = arith.constant 0.353553385 : f32
    %195 = vector.broadcast %cst_66 : f32 to vector<8x8xf32>
    %196 = arith.mulf %194, %195 : vector<8x8xf32>
    %197 = vector.broadcast %126 : vector<1x8xf32> to vector<8x8xf32>
    %198 = arith.addf %196, %197 : vector<8x8xf32>
    %cst_67 = arith.constant dense<0xFF800000> : vector<8xf32>
    %199 = vector.multi_reduction <maximumf>, %198, %cst_67 [1] : vector<8x8xf32> to vector<8xf32>
    %200 = vector.shape_cast %199 : vector<8xf32> to vector<8x1xf32>
    %201 = vector.broadcast %200 : vector<8x1xf32> to vector<8x8xf32>
    %202 = arith.subf %198, %201 : vector<8x8xf32>
    %203 = math.exp %202 : vector<8x8xf32>
    %cst_68 = arith.constant dense<0.000000e+00> : vector<8xf32>
    %204 = vector.multi_reduction <add>, %203, %cst_68 [1] : vector<8x8xf32> to vector<8xf32>
    %205 = vector.shape_cast %204 : vector<8xf32> to vector<8x1xf32>
    %206 = tpu.reciprocal %205 {approx = true} : vector<8x1xf32> -> vector<8x1xf32>
    %207 = vector.broadcast %206 : vector<8x1xf32> to vector<8x8xf32>
    %208 = arith.mulf %203, %207 : vector<8x8xf32>
    %cst_69 = arith.constant dense<0.000000e+00> : vector<8x8xf32>
    %209 = tpu.matmul %208, %192, %cst_69 {dimension_numbers = #tpu.dot_dimension_numbers<[1], [0], [0], [1], [0, 0, 1, 1], [], []>} : vector<8x8xf32>, vector<8x8xf32>, vector<8x8xf32> -> vector<8x8xf32>
    %c8_70 = arith.constant 8 : index
    %c24_71 = arith.constant 24 : index
    %210 = vector.load %arg21[%c8_70, %c24_71] : memref<16x32xf32, #tpu.memory_space<vmem>>, vector<8x8xf32>
    tpu.vector_store %arg21[%c8_70, %c24_71], %209 {strides = array<i32>} : memref<16x32xf32, #tpu.memory_space<vmem>>, vector<8x8xf32>,
    %c0_72 = arith.constant 0 : index
    %c0_73 = arith.constant 0 : index
    %211 = vector.load %arg21[%c0_72, %c0_73] : memref<16x32xf32, #tpu.memory_space<vmem>>, vector<16x32xf32>
    %c0_74 = arith.constant 0 : index
    %c0_75 = arith.constant 0 : index
    %212 = vector.load %arg6[%c0_74, %c0_75] : memref<32x32xf32, #tpu.memory_space<vmem>>, vector<32x32xf32>
    %cst_76 = arith.constant dense<0.000000e+00> : vector<16x32xf32>
    %213 = tpu.matmul %211, %212, %cst_76 {dimension_numbers = #tpu.dot_dimension_numbers<[1], [0], [0], [1], [0, 0, 1, 1], [], []>} : vector<16x32xf32>, vector<32x32xf32>, vector<16x32xf32> -> vector<16x32xf32>
    %c0_77 = arith.constant 0 : index
    %c0_78 = arith.constant 0 : index
    %214 = vector.load %arg7[%c0_77, %c0_78] : memref<1x32xf32, #tpu.memory_space<vmem>>, vector<1x32xf32>
    %215 = vector.broadcast %214 : vector<1x32xf32> to vector<16x32xf32>
    %216 = arith.addf %213, %215 : vector<16x32xf32>
    %217 = arith.addf %216, %24 : vector<16x32xf32>
    %c0_79 = arith.constant 0 : index
    %c0_80 = arith.constant 0 : index
    %218 = vector.load %arg8[%c0_79, %c0_80] : memref<1x32xf32, #tpu.memory_space<vmem>>, vector<1x32xf32>
    %c0_81 = arith.constant 0 : index
    %c0_82 = arith.constant 0 : index
    %219 = vector.load %arg9[%c0_81, %c0_82] : memref<1x32xf32, #tpu.memory_space<vmem>>, vector<1x32xf32>
    %cst_83 = arith.constant dense<0.000000e+00> : vector<16xf32>
    %220 = vector.multi_reduction <add>, %217, %cst_83 [1] : vector<16x32xf32> to vector<16xf32>
    %221 = vector.shape_cast %220 : vector<16xf32> to vector<16x1xf32>
    %cst_84 = arith.constant 3.200000e+01 : f32
    %222 = vector.broadcast %cst_84 : f32 to vector<16x1xf32>
    %223 = arith.divf %221, %222 : vector<16x1xf32>
    %224 = vector.broadcast %223 : vector<16x1xf32> to vector<16x32xf32>
    %225 = arith.subf %217, %224 : vector<16x32xf32>
    %226 = arith.mulf %225, %225 : vector<16x32xf32>
    %cst_85 = arith.constant dense<0.000000e+00> : vector<16xf32>
    %227 = vector.multi_reduction <add>, %226, %cst_85 [1] : vector<16x32xf32> to vector<16xf32>
    %228 = vector.shape_cast %227 : vector<16xf32> to vector<16x1xf32>
    %cst_86 = arith.constant 3.200000e+01 : f32
    %229 = vector.broadcast %cst_86 : f32 to vector<16x1xf32>
    %230 = arith.divf %228, %229 : vector<16x1xf32>
    %231 = vector.broadcast %223 : vector<16x1xf32> to vector<16x32xf32>
    %232 = arith.subf %217, %231 : vector<16x32xf32>
    %cst_87 = arith.constant 9.99999996E-13 : f32
    %233 = vector.broadcast %cst_87 : f32 to vector<16x1xf32>
    %234 = arith.addf %230, %233 : vector<16x1xf32>
    %235 = math.rsqrt %234 : vector<16x1xf32>
    %236 = vector.broadcast %235 : vector<16x1xf32> to vector<16x32xf32>
    %237 = arith.mulf %232, %236 : vector<16x32xf32>
    %238 = vector.broadcast %218 : vector<1x32xf32> to vector<16x32xf32>
    %239 = arith.mulf %237, %238 : vector<16x32xf32>
    %240 = vector.broadcast %219 : vector<1x32xf32> to vector<16x32xf32>
    %241 = arith.addf %239, %240 : vector<16x32xf32>
    %c0_88 = arith.constant 0 : index
    %c0_89 = arith.constant 0 : index
    %242 = vector.load %arg10[%c0_88, %c0_89] : memref<32x64xf32, #tpu.memory_space<vmem>>, vector<32x64xf32>
    %cst_90 = arith.constant dense<0.000000e+00> : vector<16x64xf32>
    %243 = tpu.matmul %241, %242, %cst_90 {dimension_numbers = #tpu.dot_dimension_numbers<[1], [0], [0], [1], [0, 0, 1, 1], [], []>} : vector<16x32xf32>, vector<32x64xf32>, vector<16x64xf32> -> vector<16x64xf32>
    %c0_91 = arith.constant 0 : index
    %c0_92 = arith.constant 0 : index
    %244 = vector.load %arg11[%c0_91, %c0_92] : memref<1x64xf32, #tpu.memory_space<vmem>>, vector<1x64xf32>
    %245 = vector.broadcast %244 : vector<1x64xf32> to vector<16x64xf32>
    %246 = arith.addf %243, %245 : vector<16x64xf32>
    %247 = arith.mulf %246, %246 : vector<16x64xf32>
    %248 = arith.mulf %246, %247 : vector<16x64xf32>
    %cst_93 = arith.constant 4.471500e-02 : f32
    %249 = vector.broadcast %cst_93 : f32 to vector<16x64xf32>
    %250 = arith.mulf %249, %248 : vector<16x64xf32>
    %251 = arith.addf %246, %250 : vector<16x64xf32>
    %cst_94 = arith.constant 0.797884583 : f32
    %252 = vector.broadcast %cst_94 : f32 to vector<16x64xf32>
    %253 = arith.mulf %252, %251 : vector<16x64xf32>
    %254 = math.tanh %253 : vector<16x64xf32>
    %cst_95 = arith.constant 1.000000e+00 : f32
    %255 = vector.broadcast %cst_95 : f32 to vector<16x64xf32>
    %256 = arith.addf %255, %254 : vector<16x64xf32>
    %cst_96 = arith.constant 5.000000e-01 : f32
    %257 = vector.broadcast %cst_96 : f32 to vector<16x64xf32>
    %258 = arith.mulf %257, %256 : vector<16x64xf32>
    %259 = arith.mulf %246, %258 : vector<16x64xf32>
    %c0_97 = arith.constant 0 : index
    %c0_98 = arith.constant 0 : index
    %260 = vector.load %arg12[%c0_97, %c0_98] : memref<64x32xf32, #tpu.memory_space<vmem>>, vector<64x32xf32>
    %cst_99 = arith.constant dense<0.000000e+00> : vector<16x32xf32>
    %261 = tpu.matmul %259, %260, %cst_99 {dimension_numbers = #tpu.dot_dimension_numbers<[1], [0], [0], [1], [0, 0, 1, 1], [], []>} : vector<16x64xf32>, vector<64x32xf32>, vector<16x32xf32> -> vector<16x32xf32>
    %c0_100 = arith.constant 0 : index
    %c0_101 = arith.constant 0 : index
    %262 = vector.load %arg13[%c0_100, %c0_101] : memref<1x32xf32, #tpu.memory_space<vmem>>, vector<1x32xf32>
    %263 = vector.broadcast %262 : vector<1x32xf32> to vector<16x32xf32>
    %264 = arith.addf %261, %263 : vector<16x32xf32>
    %265 = arith.addf %264, %241 : vector<16x32xf32>
    %c0_102 = arith.constant 0 : index
    %c0_103 = arith.constant 0 : index
    %266 = vector.load %arg14[%c0_102, %c0_103] : memref<1x32xf32, #tpu.memory_space<vmem>>, vector<1x32xf32>
    %c0_104 = arith.constant 0 : index
    %c0_105 = arith.constant 0 : index
    %267 = vector.load %arg15[%c0_104, %c0_105] : memref<1x32xf32, #tpu.memory_space<vmem>>, vector<1x32xf32>
    %cst_106 = arith.constant dense<0.000000e+00> : vector<16xf32>
    %268 = vector.multi_reduction <add>, %265, %cst_106 [1] : vector<16x32xf32> to vector<16xf32>
    %269 = vector.shape_cast %268 : vector<16xf32> to vector<16x1xf32>
    %cst_107 = arith.constant 3.200000e+01 : f32
    %270 = vector.broadcast %cst_107 : f32 to vector<16x1xf32>
    %271 = arith.divf %269, %270 : vector<16x1xf32>
    %272 = vector.broadcast %271 : vector<16x1xf32> to vector<16x32xf32>
    %273 = arith.subf %265, %272 : vector<16x32xf32>
    %274 = arith.mulf %273, %273 : vector<16x32xf32>
    %cst_108 = arith.constant dense<0.000000e+00> : vector<16xf32>
    %275 = vector.multi_reduction <add>, %274, %cst_108 [1] : vector<16x32xf32> to vector<16xf32>
    %276 = vector.shape_cast %275 : vector<16xf32> to vector<16x1xf32>
    %cst_109 = arith.constant 3.200000e+01 : f32
    %277 = vector.broadcast %cst_109 : f32 to vector<16x1xf32>
    %278 = arith.divf %276, %277 : vector<16x1xf32>
    %279 = vector.broadcast %271 : vector<16x1xf32> to vector<16x32xf32>
    %280 = arith.subf %265, %279 : vector<16x32xf32>
    %cst_110 = arith.constant 9.99999996E-13 : f32
    %281 = vector.broadcast %cst_110 : f32 to vector<16x1xf32>
    %282 = arith.addf %278, %281 : vector<16x1xf32>
    %283 = math.rsqrt %282 : vector<16x1xf32>
    %284 = vector.broadcast %283 : vector<16x1xf32> to vector<16x32xf32>
    %285 = arith.mulf %280, %284 : vector<16x32xf32>
    %286 = vector.broadcast %266 : vector<1x32xf32> to vector<16x32xf32>
    %287 = arith.mulf %285, %286 : vector<16x32xf32>
    %288 = vector.broadcast %267 : vector<1x32xf32> to vector<16x32xf32>
    %289 = arith.addf %287, %288 : vector<16x32xf32>
    %290 = vector.extract_strided_slice %289 {offsets = [0, 0], sizes = [1, 32], strides = [1, 1]} : vector<16x32xf32> to vector<1x32xf32>
    %c0_111 = arith.constant 0 : index
    %c0_112 = arith.constant 0 : index
    %291 = vector.load %arg22[%c0_111, %c0_112] : memref<2x32xf32, #tpu.memory_space<vmem>>, vector<1x32xf32>
    tpu.vector_store %arg22[%c0_111, %c0_112], %290 {strides = array<i32>} : memref<2x32xf32, #tpu.memory_space<vmem>>, vector<1x32xf32>,
    %292 = vector.extract_strided_slice %289 {offsets = [8, 0], sizes = [1, 32], strides = [1, 1]} : vector<16x32xf32> to vector<1x32xf32>
    %c1_113 = arith.constant 1 : index
    %c0_114 = arith.constant 0 : index
    %293 = vector.load %arg22[%c1_113, %c0_114] : memref<2x32xf32, #tpu.memory_space<vmem>>, vector<1x32xf32>
    tpu.vector_store %arg22[%c1_113, %c0_114], %292 {strides = array<i32>} : memref<2x32xf32, #tpu.memory_space<vmem>>, vector<1x32xf32>,
    %c0_115 = arith.constant 0 : index
    %c0_116 = arith.constant 0 : index
    %294 = vector.load %arg22[%c0_115, %c0_116] : memref<2x32xf32, #tpu.memory_space<vmem>>, vector<2x32xf32>
    %c0_117 = arith.constant 0 : index
    %c0_118 = arith.constant 0 : index
    %295 = vector.load %arg16[%c0_117, %c0_118] : memref<32x32xf32, #tpu.memory_space<vmem>>, vector<32x32xf32>
    %cst_119 = arith.constant dense<0.000000e+00> : vector<2x32xf32>
    %296 = tpu.matmul %294, %295, %cst_119 {dimension_numbers = #tpu.dot_dimension_numbers<[1], [0], [0], [1], [0, 0, 1, 1], [], []>} : vector<2x32xf32>, vector<32x32xf32>, vector<2x32xf32> -> vector<2x32xf32>
    %c0_120 = arith.constant 0 : index
    %c0_121 = arith.constant 0 : index
    %297 = vector.load %arg17[%c0_120, %c0_121] : memref<1x32xf32, #tpu.memory_space<vmem>>, vector<1x32xf32>
    %298 = vector.broadcast %297 : vector<1x32xf32> to vector<2x32xf32>
    %299 = arith.addf %296, %298 : vector<2x32xf32>
    %300 = math.tanh %299 : vector<2x32xf32>
    %c0_122 = arith.constant 0 : index
    %c0_123 = arith.constant 0 : index
    %301 = vector.load %arg18[%c0_122, %c0_123] : memref<32x128xf32, #tpu.memory_space<vmem>>, vector<32x128xf32>
    %cst_124 = arith.constant dense<0.000000e+00> : vector<2x128xf32>
    %302 = tpu.matmul %300, %301, %cst_124 {dimension_numbers = #tpu.dot_dimension_numbers<[1], [0], [0], [1], [0, 0, 1, 1], [], []>} : vector<2x32xf32>, vector<32x128xf32>, vector<2x128xf32> -> vector<2x128xf32>
    %c0_125 = arith.constant 0 : index
    %c0_126 = arith.constant 0 : index
    %303 = vector.load %arg19[%c0_125, %c0_126] : memref<1x128xf32, #tpu.memory_space<vmem>>, vector<1x128xf32>
    %304 = vector.broadcast %303 : vector<1x128xf32> to vector<2x128xf32>
    %305 = arith.addf %302, %304 : vector<2x128xf32>
    %c0_127 = arith.constant 0 : index
    %c0_128 = arith.constant 0 : index
    %306 = vector.load %arg20[%c0_127, %c0_128] : memref<2x128xf32, #tpu.memory_space<vmem>>, vector<2x128xf32>
    tpu.vector_store %arg20[%c0_127, %c0_128], %305 {strides = array<i32>} : memref<2x128xf32, #tpu.memory_space<vmem>>, vector<2x128xf32>,
    return
  }
}

</mosaic_0001>

<bundles_post_ra>
// kernel: bert_classifier_forward.1
= control target key start
LH: loop header
LB: loop body
LE: loop exit
PB: predicated region body
PF: predicated region fallthrough
CT: control target
= control target key end

     0   :  { %s3007_s0 = inlined_call_operand.vmem [shape: s32[2], index: 0, kind: input, shape index: {}]   ;;  %s3008_s1 = inlined_call_operand.vmem [shape: f32[16,32], index: 1, kind: input, shape index: {}]   ;;  %s3009_s2 = inlined_call_operand.vmem [shape: f32[32,96], index: 2, kind: input, shape index: {}]   ;;  %s3010_s3 = inlined_call_operand.vmem [shape: f32[1,96], index: 3, kind: input, shape index: {}]   ;;  %s3011_s4 = inlined_call_operand.vmem [shape: f32[1,32], index: 4, kind: input, shape index: {}]   ;;  %s3012_s5 = inlined_call_operand.vmem [shape: f32[1,32], index: 5, kind: input, shape index: {}]   ;;  %s3013_s6 = inlined_call_operand.vmem [shape: f32[32,32], index: 6, kind: input, shape index: {}]   ;;  %s3014_s7 = inlined_call_operand.vmem [shape: f32[1,32], index: 7, kind: input, shape index: {}]   ;;  %s3015_s8 = inlined_call_operand.vmem [shape: f32[1,32], index: 8, kind: input, shape index: {}]   ;;  %s3016_s9 = inlined_call_operand.vmem [shape: f32[1,32], index: 9, kind: input, shape index: {}]   ;;  %s3017_s10 = inlined_call_operand.vmem [shape: f32[32,64], index: 10, kind: input, shape index: {}]   ;;  %s3018_s11 = inlined_call_operand.vmem [shape: f32[1,64], index: 11, kind: input, shape index: {}]   ;;  %s3019_s12 = inlined_call_operand.vmem [shape: f32[64,32], index: 12, kind: input, shape index: {}]   ;;  %s3020_s13 = inlined_call_operand.vmem [shape: f32[1,32], index: 13, kind: input, shape index: {}]   ;;  %s3021_s14 = inlined_call_operand.vmem [shape: f32[1,32], index: 14, kind: input, shape index: {}]   ;;  %s3022_s15 = inlined_call_operand.vmem [shape: f32[1,32], index: 15, kind: input, shape index: {}]   ;;  %s3023_s16 = inlined_call_operand.vmem [shape: f32[32,32], index: 16, kind: input, shape index: {}]   ;;  %s3024_s17 = inlined_call_operand.vmem [shape: f32[1,32], index: 17, kind: input, shape index: {}]   ;;  %s3025_s18 = inlined_call_operand.vmem [shape: f32[32,128], index: 18, kind: input, shape index: {}]   ;;  %s3026_s19 = inlined_call_operand.vmem [shape: f32[1,128], index: 19, kind: input, shape index: {}]   ;;  %s3027_s20 = inlined_call_operand.hbm [shape: f32[2,128], index: 20, kind: output, shape index: {}]  }
   0x1   :  { %3030 = sst [smem:[#allocation10_spill]] %s3007_s0 }
   0x2   :  { %3031 = sst [smem:[#allocation11_spill]] %s3008_s1 }
   0x3   :  { %3032 = sst [smem:[#allocation12_spill]] %s3009_s2 }
   0x4   :  { %3033 = sst [smem:[#allocation13_spill]] %s3010_s3 }
   0x5   :  { %3034 = sst [smem:[#allocation14_spill]] %s3011_s4 }
   0x6   :  { %25 = vsyncpa [#allocation6], 0 }
   0x7   :  { %26 = vsyncpa [#allocation5], 0  ;;  %s3035_s23 = sld [smem:[#allocation10_spill]] }
   0xd   :  { %s33_s24 = sshll.u32 %s3035_s23, 4  ;;  %s34_s24 = int_to_ptr.vmem [resolvable:$true] %s33_s24 }
   0xe   :  { %s2521_s2 = scalar_lea.vmem %s34_s24, 16  ;;  %p2526_p1 = scmp.lt.s32.totalorder %s34_s24, %s34_s24 }
   0xf   :  { %p2522_p0 = scmp.ne.s32.totalorder %s34_s24, %s2521_s2  ;;  %p2527_p2 = scmp.lt.s32.totalorder %s2521_s2, %s2521_s2 }
  0x11   :  { %p2528_p3 = por %p2527_p2, %p2526_p1 }
  0x13   :  { %p2529_p4 = pnand %p2528_p3, %p2522_p0 }
  0x15   :  { %2532 = shalt.err (!%p2529_p4)
}
  0x16   :  { %s2557_s25 = smov [#allocation4]  }
  0x17   :  { %36 = dma.vmem_to_smem %s34_s24, 16, %s2557_s25, [#allocation6]  }
  0x18   :  { %2553 = dma.done.wait [#allocation6], 16  }
  0x19   :  { %2554 = vsyncadd [#allocation6], 4294967280 }
  0x1a   :  { %78 = sfence }
  0x1b   :  { %s3036_s27 = sld [smem:[#allocation11_spill]]  ;;  %vm83_vm0 = vcmask 261120   ;;  %v2182_v27 = vld [vmem:[%s3012_s5] ss:$0 sm:$0xff]  ;;  %v2558_v34 = vmov 0.0   ;;  %vm2559_vm1 = vmmov 0   ;;  %v219_v54 = vlaneseq }
  0x1c   :  { %s3037_s0 = sld [smem:[#allocation12_spill]]  ;;  %2309 = vmatprep.subr.mxu1 %v2558_v34  ;;  %2311 = vmatprep.mubr.msk.f32.mxu1 %vm2559_vm1, %v2558_v34  ;;  %s2560_s30 = smov 88   ;;  %vm228_vm2 = vcmask 64512   ;;  %v2567_v58 = vmov -1e+09   ;;  %vm564_vm5 = vcmask 130112  }
  0x1d   :  { %s3038_s26 = sld [smem:[#allocation14_spill]]  ;;  %s2562_s21 = smov 120   ;;  %v220_v55 = vand.u32 127, %v219_v54  ;;  %vm737_vm6 = vcmask 195712   ;;  %vm910_vm7 = vcmask 261312   ;;  %vm1864_vm8 = vcmask 523264  }
  0x1e   :  { %s3039_s29 = sld [smem:[#allocation13_spill]]  ;;  %s2563_s1 = smov 112   ;;  %vm1992_vm9 = vcmask 253952  }
  0x1f   :  { %s2564_s22 = smov 80   ;;  %s2565_s23 = smov 104  }
  0x20   :  { %s2566_s24 = smov 72   ;;  %s221_s2 = sld [smem:[#allocation4]] }
  0x21   :  { %v79_v0 = vld [vmem:[%s3036_s27] sm:$0xff]  ;;  %v80_v1 = vld [vmem:[%s3036_s27 + $0x8] sm:$0xff]  ;;  %s2198_s25 = sld [smem:[#allocation4 + $0x1]]  ;;  %s2568_s3 = smov 64  }
  0x22   :  { %v84_v2 = vsel %vm83_vm0, %v79_v0, 0.0  ;;  %v87_v3 = vsel %vm83_vm0, %v80_v1, 0.0  ;;  %v130_v14 = vld [vmem:[%s3037_s0 + $0x18] sm:$0xff]  ;;  %v129_v15 = vld [vmem:[%s3037_s0 + $0x10] sm:$0xff]  ;;  %v128_v16 = vld [vmem:[%s3037_s0 + $0x8] sm:$0xff]  ;;  %s2570_s27 = smov 40  }
  0x23   :  { %85 = vadd.xlane.f32.xlu0 %v84_v2  ;;  %2298 = vmatprep.subr.mxu0 %v130_v14  ;;  %v127_v17 = vld [vmem:[%s3037_s0] sm:$0xff]  ;;  %s2561_s0 = smov 96   ;;  %s2571_s28 = smov 56  }
  0x24   :  { %2299 = vmatpush3.msra.mxu0 %v130_v14  ;;  %v2181_v25 = vld [vmem:[%s3038_s26] ss:$0 sm:$0xff]  ;;  %s2569_s26 = smov 48   ;;  %s2572_s5 = smov 8  }
  0x25   :  { %2300 = vmatprep.subr.mxu0 %v129_v15  ;;  %v2183_v36 = vld [vmem:[%s3039_s29] ss:$0 sm:$0xff]  ;;  %s2573_s4 = smov 16   ;;  %s2574_s29 = smov 24  }
  0x26   :  { %2301 = vmatpush3.msra.mxu0 %v129_v15  ;;  %v222_v56 = vstv %s221_s2 }
  0x27   :  { %88 = vadd.xlane.f32.xlu0 %v87_v3  ;;  %2302 = vmatprep.subr.mxu0 %v128_v16  ;;  %vm223_vm3 = vcmp.lt.s32.totalorder %v220_v55, %v222_v56 }
  0x28   :  { %2303 = vmatpush3.msra.mxu0 %v128_v16  ;;  %v224_v59 = vsel %vm223_vm3, 0.0, %v2567_v58 }
  0x29   :  { %2304 = vmatprep.subr.mxu0 %v127_v17 }
  0x2a   :  { %2305 = vmatpush3.msra.mxu0 %v127_v17 }
  0x2b   :  { %2319 = vmatprep.subr.mxu0 %v2558_v34 }
  0xac   :  { %v86_v4 = vpop.xlane.xlu0 %85 }
  0xad   :  { %v91_v5 = vmul.f32 0.03125, %v86_v4 }
  0xaf   :  { %v93_v6 = vsub.f32 %v79_v0, %v91_v5 }
  0xb0   :  { %v89_v7 = vpop.xlane.xlu0 %88 }
  0xb1   :  { %v92_v8 = vmul.f32 0.03125, %v89_v7  ;;  %v95_v9 = vmul.f32 %v93_v6, %v93_v6 }
  0xb3   :  { %v94_v10 = vsub.f32 %v80_v1, %v92_v8  ;;  %v97_v11 = vsel %vm83_vm0, %v95_v9, 0.0  ;;  %v913_v8 = vstv %s2198_s25 }
  0xb4   :  { %98 = vadd.xlane.f32.xlu1 %v97_v11  ;;  %vm914_vm4 = vcmp.lt.s32.totalorder %v220_v55, %v913_v8 }
  0xb5   :  { %v96_v12 = vmul.f32 %v94_v10, %v94_v10  ;;  %v915_v16 = vsel %vm914_vm4, 0.0, %v2567_v58 }
  0xb7   :  { %v100_v13 = vsel %vm83_vm0, %v96_v12, 0.0 }
  0xb8   :  { %101 = vadd.xlane.f32.xlu1 %v100_v13 }
 0x13d   :  { %v99_v18 = vpop.xlane.xlu1 %98 }
 0x13e   :  { %v103_v19 = vmul.f32 0.03125, %v99_v18 }
 0x140   :  { %v105_v20 = vadd.f32 1e-12, %v103_v19 }
 0x141   :  { %v102_v21 = vpop.xlane.xlu1 %101 }
 0x142   :  { %2471 = vrsqrt.f32 %v105_v20  ;;  %v104_v22 = vmul.f32 0.03125, %v102_v21 }
 0x144   :  { %v106_v23 = vadd.f32 1e-12, %v104_v22 }
 0x146   :  { %2473 = vrsqrt.f32 %v106_v23 }
 0x14f   :  { %v2472_v24 = vpop.eup %2471 }
 0x150   :  { %v109_v26 = vmul.f32 %v2472_v24, %v93_v6 }
 0x152   :  { %v117_v28 = vmul.f32 %v2181_v25, %v109_v26 }
 0x153   :  { %v2474_v29 = vpop.eup %2473 }
 0x154   :  { %v110_v30 = vmul.f32 %v2474_v29, %v94_v10  ;;  %v2712_v31 = vadd.f32 %v2182_v27, %v117_v28 }
 0x156   :  { %v118_v32 = vmul.f32 %v2181_v25, %v110_v30  ;;  %2306 = vmatprep.mubr.msk.f32.mxu0 %vm83_vm0, %v2712_v31 }
 0x158   :  { %v2716_v33 = vadd.f32 %v2182_v27, %v118_v32 }
 0x15a   :  { %2307 = vmatmul.mubr.msk.f32.vlgmr.msra.gmra.mxu0 %vm83_vm0, %v2716_v33 }
 0x15b   :  { %2321 = vmatprep.mubr.msk.f32.mxu0 %vm2559_vm1, %v2558_v34 }
 0x21a   :  { %v2308_v35 = vpop.f32.mrf.mxu0 }
 0x21b   :  { %v2737_v39 = vadd.f32 %v2308_v35, %v2183_v36 }
 0x21c   :  { %v210_v37 = vpop.f32.mrf.mxu0 }
 0x21d   :  { %v2729_v38 = vadd.f32 %v2183_v36, %v210_v37 }
 0x21f   :  { %395 = vrot.lane.b32.xlu1 %v2729_v38, %s2560_s30  ;;  %226 = vrot.lane.b32.xlu0 %v2729_v38, %s2561_s0 }
 0x223   :  { %393 = vrot.lane.b32.xlu1 %v2729_v38, %s2562_s21  ;;  %566 = vrot.lane.b32.xlu0 %v2729_v38, %s2563_s1 }
 0x227   :  { %568 = vrot.lane.b32.xlu1 %v2729_v38, %s2564_s22  ;;  %739 = vrot.lane.b32.xlu0 %v2729_v38, %s2565_s23 }
 0x22b   :  { %741 = vrot.lane.b32.xlu1 %v2729_v38, %s2566_s24  ;;  %1085 = vrot.lane.b32.xlu0 %v2737_v39, %s2560_s30 }
 0x22f   :  { %917 = vrot.lane.b32.xlu1 %v2737_v39, %s2561_s0  ;;  %1257 = vrot.lane.b32.xlu0 %v2737_v39, %s2564_s22 }
 0x233   :  { %1083 = vrot.lane.b32.xlu1 %v2737_v39, %s2562_s21  ;;  %1429 = vrot.lane.b32.xlu0 %v2737_v39, %s2566_s24 }
 0x237   :  { %1255 = vrot.lane.b32.xlu1 %v2737_v39, %s2563_s1 }
 0x23b   :  { %1427 = vrot.lane.b32.xlu1 %v2737_v39, %s2565_s23 }
 0x291   :  { %v396_v40 = vpop.permute.xlu1 %395  ;;  %v227_v41 = vpop.permute.xlu0 %226 }
 0x292   :  { %2310 = vmatpush3.xpose.msk.msra.mxu1 %vm228_vm2, %v227_v41  ;;  %2320 = vmatpush3.xpose.msk.msra.mxu0 %vm228_vm2, %v396_v40 }
 0x293   :  { %2329 = vmatprep.subr.mxu0 %v2558_v34  ;;  %2314 = vmatprep.subr.mxu1 %v2558_v34 }
 0x295   :  { %v394_v42 = vpop.permute.xlu1 %393  ;;  %2312 = vmatmul.mubr.msk.f32.vlgmr.msra.gmra.mxu1 %vm228_vm2, %v2729_v38  ;;  %v567_v43 = vpop.permute.xlu0 %566 }
 0x296   :  { %2322 = vmatmul.mubr.msk.f32.vlgmr.msra.gmra.mxu0 %vm228_vm2, %v394_v42  ;;  %2316 = vmatprep.mubr.msk.f32.mxu1 %vm2559_vm1, %v2558_v34 }
 0x297   :  { %2331 = vmatprep.mubr.msk.f32.mxu0 %vm2559_vm1, %v2558_v34 }
 0x299   :  { %v569_v44 = vpop.permute.xlu1 %568  ;;  %v740_v45 = vpop.permute.xlu0 %739 }
 0x29a   :  { %2330 = vmatpush3.xpose.msk.msra.mxu0 %vm228_vm2, %v569_v44 }
 0x29b   :  { %2339 = vmatprep.subr.mxu0 %v2558_v34 }
 0x29d   :  { %v742_v46 = vpop.permute.xlu1 %741  ;;  %2332 = vmatmul.mubr.msk.f32.vlgmr.msra.gmra.mxu0 %vm228_vm2, %v567_v43  ;;  %v1086_v47 = vpop.permute.xlu0 %1085 }
 0x29e   :  { %2340 = vmatpush3.xpose.msk.msra.mxu0 %vm228_vm2, %v742_v46  ;;  %2341 = vmatprep.mubr.msk.f32.mxu0 %vm2559_vm1, %v2558_v34 }
 0x29f   :  { %2349 = vmatprep.subr.mxu0 %v2558_v34 }
 0x2a1   :  { %v918_v48 = vpop.permute.xlu1 %917  ;;  %2342 = vmatmul.mubr.msk.f32.vlgmr.msra.gmra.mxu0 %vm228_vm2, %v740_v45  ;;  %v1258_v50 = vpop.permute.xlu0 %1257 }
 0x2a2   :  { %2350 = vmatpush3.xpose.msk.msra.mxu0 %vm228_vm2, %v918_v48  ;;  %2351 = vmatprep.mubr.msk.f32.mxu0 %vm2559_vm1, %v2558_v34 }
 0x2a3   :  { %2359 = vmatprep.subr.mxu0 %v2558_v34 }
 0x2a5   :  { %v1084_v49 = vpop.permute.xlu1 %1083  ;;  %2352 = vmatmul.mubr.msk.f32.vlgmr.msra.gmra.mxu0 %vm228_vm2, %v2737_v39  ;;  %v1430_v52 = vpop.permute.xlu0 %1429 }
 0x2a6   :  { %2360 = vmatpush3.xpose.msk.msra.mxu0 %vm228_vm2, %v1086_v47  ;;  %2361 = vmatprep.mubr.msk.f32.mxu0 %vm2559_vm1, %v2558_v34 }
 0x2a7   :  { %2369 = vmatprep.subr.mxu0 %v2558_v34 }
 0x2a9   :  { %2362 = vmatmul.mubr.msk.f32.vlgmr.msra.gmra.mxu0 %vm228_vm2, %v1084_v49  ;;  %v1256_v51 = vpop.permute.xlu1 %1255 }
 0x2aa   :  { %2370 = vmatpush3.xpose.msk.msra.mxu0 %vm228_vm2, %v1258_v50  ;;  %2371 = vmatprep.mubr.msk.f32.mxu0 %vm2559_vm1, %v2558_v34 }
 0x2ab   :  { %2379 = vmatprep.subr.mxu0 %v2558_v34 }
 0x2ad   :  { %2372 = vmatmul.mubr.msk.f32.vlgmr.msra.gmra.mxu0 %vm228_vm2, %v1256_v51  ;;  %v1428_v53 = vpop.permute.xlu1 %1427 }
 0x2ae   :  { %2380 = vmatpush3.xpose.msk.msra.mxu0 %vm228_vm2, %v1430_v52  ;;  %2381 = vmatprep.mubr.msk.f32.mxu0 %vm2559_vm1, %v2558_v34 }
 0x2b1   :  { %2382 = vmatmul.mubr.msk.f32.vlgmr.msra.gmra.mxu0 %vm228_vm2, %v1428_v53 }
 0x355   :  { %v299_v57 = vpop.f32.mrf.mxu1 }
 0x356   :  { %v303_v60 = vmul.f32 0.35355338, %v299_v57  ;;  %v467_v61 = vpop.f32.mrf.mxu0 }
 0x357   :  { %v471_v62 = vmul.f32 0.35355338, %v467_v61  ;;  %v2313_v63 = vpop.f32.mrf.mxu1 }
 0x358   :  { %v2323_v0 = vpop.f32.mrf.mxu0  ;;  %v304_v1 = vadd.f32 %v303_v60, %v224_v59 }
 0x359   :  { %v472_v2 = vadd.f32 %v471_v62, %v224_v59 }
 0x35a   :  { %v305_v3 = vsel %vm228_vm2, %v304_v1, -inf }
 0x35b   :  { %306 = vmax.xlane.f32.xlu0 %v305_v3  ;;  %v473_v4 = vsel %vm228_vm2, %v472_v2, -inf }
 0x35c   :  { %474 = vmax.xlane.f32.xlu1 %v473_v4 }
 0x35d   :  { %v640_v5 = vpop.f32.mrf.mxu0 }
 0x35e   :  { %v644_v6 = vmul.f32 0.35355338, %v640_v5 }
 0x35f   :  { %v2333_v7 = vpop.f32.mrf.mxu0 }
 0x360   :  { %v2788_v9 = vadd.f32 %v644_v6, %v224_v59 }
 0x361   :  { %v813_v10 = vpop.f32.mrf.mxu0 }
 0x362   :  { %v817_v11 = vmul.f32 0.35355338, %v813_v10  ;;  %v646_v12 = vsel %vm228_vm2, %v2788_v9, -inf }
 0x363   :  { %647 = vmax.xlane.f32.xlu0 %v646_v12  ;;  %v2343_v13 = vpop.f32.mrf.mxu0 }
 0x364   :  { %v818_v14 = vadd.f32 %v817_v11, %v224_v59 }
 0x365   :  { %v989_v15 = vpop.f32.mrf.mxu0 }
 0x366   :  { %v993_v17 = vmul.f32 0.35355338, %v989_v15  ;;  %v819_v18 = vsel %vm228_vm2, %v818_v14, -inf }
 0x367   :  { %820 = vmax.xlane.f32.xlu0 %v819_v18  ;;  %v2353_v19 = vpop.f32.mrf.mxu0 }
 0x368   :  { %v2793_v20 = vadd.f32 %v993_v17, %v915_v16 }
 0x369   :  { %v1157_v21 = vpop.f32.mrf.mxu0 }
 0x36a   :  { %v1161_v22 = vmul.f32 0.35355338, %v1157_v21  ;;  %v995_v23 = vsel %vm228_vm2, %v2793_v20, -inf }
 0x36b   :  { %996 = vmax.xlane.f32.xlu0 %v995_v23  ;;  %v2363_v24 = vpop.f32.mrf.mxu0 }
 0x36c   :  { %v1162_v25 = vadd.f32 %v1161_v22, %v915_v16 }
 0x36d   :  { %v1329_v26 = vpop.f32.mrf.mxu0 }
 0x36e   :  { %v1333_v27 = vmul.f32 0.35355338, %v1329_v26  ;;  %v1163_v28 = vsel %vm228_vm2, %v1162_v25, -inf }
 0x36f   :  { %1164 = vmax.xlane.f32.xlu1 %v1163_v28  ;;  %v2373_v29 = vpop.f32.mrf.mxu0 }
 0x370   :  { %v1334_v30 = vadd.f32 %v1333_v27, %v915_v16 }
 0x371   :  { %v1501_v32 = vpop.f32.mrf.mxu0 }
 0x372   :  { %v1335_v35 = vsel %vm228_vm2, %v1334_v30, -inf  ;;  %v1505_v37 = vmul.f32 0.35355338, %v1501_v32 }
 0x373   :  { %1336 = vmax.xlane.f32.xlu0 %v1335_v35  ;;  %v2383_v36 = vpop.f32.mrf.mxu0 }
 0x374   :  { %v1506_v40 = vadd.f32 %v1505_v37, %v915_v16 }
 0x376   :  { %v1507_v41 = vsel %vm228_vm2, %v1506_v40, -inf }
 0x380   :  { %316 = vrot.lane.b32.xlu1 %v2729_v38, %s2568_s3 }
 0x3a4   :  { %1508 = vmax.xlane.f32.xlu1 %v1507_v41 }
 0x3b5   :  { %657 = vrot.lane.b32.xlu1 %v2729_v38, %s2569_s26 }
 0x3b9   :  { %830 = vrot.lane.b32.xlu1 %v2729_v38, %s2570_s27 }
 0x3bd   :  { %1006 = vrot.lane.b32.xlu1 %v2737_v39, %s2568_s3 }
 0x3e4   :  { %v307_v42 = vpop.xlane.xlu0 %306 }
 0x3e5   :  { %v308_v43 = vsub.f32 %v304_v1, %v307_v42  ;;  %v475_v44 = vpop.xlane.xlu1 %474 }
 0x3e6   :  { %v476_v45 = vsub.f32 %v472_v2, %v475_v44 }
 0x3e7   :  { %v309_v46 = vmul.f32 1.442695, %v308_v43 }
 0x3e8   :  { %v477_v47 = vmul.f32 1.442695, %v476_v45 }
 0x3e9   :  { %2475 = vpow2.f32 %v309_v46 }
 0x3ea   :  { %2477 = vpow2.f32 %v477_v47 }
 0x3ec   :  { %v648_v48 = vpop.xlane.xlu0 %647 }
 0x3ed   :  { %v649_v60 = vsub.f32 %v2788_v9, %v648_v48 }
 0x3ef   :  { %v650_v62 = vmul.f32 1.442695, %v649_v60 }
 0x3f0   :  { %v821_v49 = vpop.xlane.xlu0 %820 }
 0x3f1   :  { %v822_v50 = vsub.f32 %v818_v14, %v821_v49 }
 0x3f3   :  { %v823_v51 = vmul.f32 1.442695, %v822_v50 }
 0x3f4   :  { %v997_v61 = vpop.xlane.xlu0 %996 }
 0x3f5   :  { %2479 = vpow2.f32 %v823_v51  ;;  %v998_v63 = vsub.f32 %v2793_v20, %v997_v61 }
 0x3f6   :  { %v2476_v52 = vpop.eup %2475  ;;  %2481 = vpow2.f32 %v650_v62  ;;  %v1604_v62 = vld [vmem:[%s3013_s6 + $0x18] sm:$0xff] }
 0x3f7   :  { %v2806_v53 = vpop.eup %2477  ;;  %v311_v54 = vsel %vm228_vm2, %v2476_v52, 0.0  ;;  %v999_v1 = vmul.f32 1.442695, %v998_v63  ;;  %v1603_v63 = vld [vmem:[%s3013_s6 + $0x10] sm:$0xff]  ;;  %2389 = vmatprep.subr.mxu0 %v1604_v62 }
 0x3f8   :  { %v1165_v55 = vpop.xlane.xlu1 %1164  ;;  %312 = vadd.xlane.f32.xlu0 %v311_v54  ;;  %v479_v56 = vsel %vm228_vm2, %v2806_v53, 0.0  ;;  %2390 = vmatpush3.msra.mxu0 %v1604_v62  ;;  %v1851_v62 = vld [vmem:[%s3019_s12 + $0x10] sm:$0xff] }
 0x3f9   :  { %480 = vadd.xlane.f32.xlu1 %v479_v56  ;;  %2483 = vpow2.f32 %v999_v1  ;;  %v1166_v3 = vsub.f32 %v1162_v25, %v1165_v55  ;;  %v1602_v1 = vld [vmem:[%s3013_s6 + $0x8] sm:$0xff]  ;;  %2391 = vmatprep.subr.mxu0 %v1603_v63 }
 0x3fa   :  { %2392 = vmatpush3.msra.mxu0 %v1603_v63  ;;  %v1850_v63 = vld [vmem:[%s3019_s12 + $0x8] sm:$0xff] }
 0x3fb   :  { %v1167_v5 = vmul.f32 1.442695, %v1166_v3  ;;  %v1601_v3 = vld [vmem:[%s3013_s6] sm:$0xff]  ;;  %2393 = vmatprep.subr.mxu0 %v1602_v1 }
 0x3fc   :  { %v317_v57 = vpop.permute.xlu1 %316  ;;  %v1337_v0 = vpop.xlane.xlu0 %1336  ;;  %2394 = vmatpush3.msra.mxu0 %v1602_v1  ;;  %v2216_v1 = vld [vmem:[%s3018_s11] ss:$0 sm:$0xff] }
 0x3fd   :  { %2315 = vmatpush3.msra.mxu1 %v317_v57  ;;  %v1338_v2 = vsub.f32 %v1334_v30, %v1337_v0  ;;  %2395 = vmatprep.subr.mxu0 %v1601_v3 }
 0x3fe   :  { %2324 = vmatprep.subr.mxu1 %v2558_v34  ;;  %2396 = vmatpush3.msra.mxu0 %v1601_v3 }
 0x3ff   :  { %v1339_v4 = vmul.f32 1.442695, %v1338_v2 }
 0x401   :  { %2485 = vpow2.f32 %v1339_v4 }
 0x402   :  { %v2812_v58 = vpop.eup %2479  ;;  %2487 = vpow2.f32 %v1167_v5 }
 0x403   :  { %v825_v59 = vsel %vm228_vm2, %v2812_v58, 0.0  ;;  %v2482_v6 = vpop.eup %2481 }
 0x404   :  { %826 = vadd.xlane.f32.xlu1 %v825_v59 }
 0x406   :  { %v2821_v7 = vpop.eup %2483 }
 0x407   :  { %v1001_v11 = vsel %vm228_vm2, %v2821_v7, 0.0 }
 0x40e   :  { %484 = vrot.lane.b32.xlu0 %v2729_v38, %s2571_s28  ;;  %v652_v38 = vsel %vm228_vm2, %v2482_v6, 0.0  ;;  %v2825_v12 = vpop.eup %2485 }
 0x40f   :  { %v1341_v13 = vsel %vm228_vm2, %v2825_v12, 0.0  ;;  %v2488_v14 = vpop.eup %2487 }
 0x410   :  { %v1169_v15 = vsel %vm228_vm2, %v2488_v14, 0.0 }
 0x415   :  { %1174 = vrot.lane.b32.xlu1 %v2737_v39, %s2571_s28 }
 0x42d   :  { %v1509_v8 = vpop.xlane.xlu1 %1508  ;;  %653 = vadd.xlane.f32.xlu0 %v652_v38 }
 0x42e   :  { %v1510_v9 = vsub.f32 %v1506_v40, %v1509_v8 }
 0x430   :  { %v1511_v10 = vmul.f32 1.442695, %v1510_v9 }
 0x431   :  { %1002 = vadd.xlane.f32.xlu0 %v1001_v11  ;;  %v658_v18 = vpop.permute.xlu1 %657 }
 0x432   :  { %2489 = vpow2.f32 %v1511_v10 }
 0x435   :  { %1342 = vadd.xlane.f32.xlu0 %v1341_v13  ;;  %v831_v19 = vpop.permute.xlu1 %830 }
 0x439   :  { %1170 = vadd.xlane.f32.xlu1 %v1169_v15  ;;  %v1007_v20 = vpop.permute.xlu1 %1006 }
 0x43f   :  { %v2830_v16 = vpop.eup %2489 }
 0x440   :  { %v1513_v17 = vsel %vm228_vm2, %v2830_v16, 0.0 }
 0x441   :  { %1514 = vadd.xlane.f32.xlu0 %v1513_v17 }
 0x44a   :  { %1518 = vrot.lane.b32.xlu1 %v2737_v39, %s2570_s27 }
 0x457   :  { %1346 = vrot.lane.b32.xlu0 %v2737_v39, %s2569_s26 }
 0x481   :  { %v313_v21 = vpop.xlane.xlu0 %312 }
 0x482   :  { %2491 = vrcp.f32 %v313_v21  ;;  %v481_v22 = vpop.xlane.xlu1 %480 }
 0x483   :  { %2493 = vrcp.f32 %v481_v22 }
 0x485   :  { %v485_v26 = vpop.permute.xlu0 %484 }
 0x48d   :  { %v827_v27 = vpop.xlane.xlu1 %826 }
 0x48f   :  { %v2492_v23 = vpop.eup %2491 }
 0x490   :  { %v315_v24 = vmul.f32 %v2492_v23, %v2476_v52  ;;  %v2494_v25 = vpop.eup %2493 }
 0x491   :  { %v483_v39 = vmul.f32 %v2494_v25, %v2806_v53  ;;  %v1175_v30 = vpop.permute.xlu1 %1174 }
 0x492   :  { %2317 = vmatmul.mubr.msk.f32.vlgmr.msra.gmra.mxu1 %vm228_vm2, %v315_v24 }
 0x493   :  { %2325 = vmatpush3.msra.mxu1 %v485_v26  ;;  %2326 = vmatprep.mubr.msk.f32.mxu1 %vm2559_vm1, %v2558_v34 }
 0x494   :  { %2334 = vmatprep.subr.mxu1 %v2558_v34 }
 0x496   :  { %2327 = vmatmul.mubr.msk.f32.vlgmr.msra.gmra.mxu1 %vm228_vm2, %v483_v39 }
 0x497   :  { %2335 = vmatpush3.msra.mxu1 %v658_v18  ;;  %2336 = vmatprep.mubr.msk.f32.mxu1 %vm2559_vm1, %v2558_v34 }
 0x498   :  { %2344 = vmatprep.subr.mxu1 %v2558_v34 }
 0x4b6   :  { %v654_v28 = vpop.xlane.xlu0 %653 }
 0x4b7   :  { %2495 = vrcp.f32 %v654_v28 }
 0x4b8   :  { %2497 = vrcp.f32 %v827_v27 }
 0x4ba   :  { %v1003_v29 = vpop.xlane.xlu0 %1002 }
 0x4bb   :  { %2499 = vrcp.f32 %v1003_v29 }
 0x4be   :  { %v1343_v32 = vpop.xlane.xlu0 %1342 }
 0x4c2   :  { %v1171_v35 = vpop.xlane.xlu1 %1170 }
 0x4c3   :  { %2501 = vrcp.f32 %v1171_v35 }
 0x4c4   :  { %v2496_v36 = vpop.eup %2495  ;;  %2503 = vrcp.f32 %v1343_v32 }
 0x4c5   :  { %v656_v37 = vmul.f32 %v2496_v36, %v2482_v6  ;;  %v2498_v40 = vpop.eup %2497  ;;  %v1741_v36 = vld [vmem:[%s3017_s10 + $0x10] sm:$0xff] }
 0x4c6   :  { %v829_v41 = vmul.f32 %v2498_v40, %v2812_v58  ;;  %v1519_v50 = vpop.permute.xlu1 %1518  ;;  %v1739_v40 = vld [vmem:[%s3017_s10] sm:$0xff] }
 0x4c7   :  { %2337 = vmatmul.mubr.msk.f32.vlgmr.msra.gmra.mxu1 %vm228_vm2, %v656_v37  ;;  %v1740_v37 = vld [vmem:[%s3017_s10 + $0x8] sm:$0xff] }
 0x4c8   :  { %2345 = vmatpush3.msra.mxu1 %v831_v19  ;;  %2346 = vmatprep.mubr.msk.f32.mxu1 %vm2559_vm1, %v2558_v34  ;;  %v2500_v42 = vpop.eup %2499 }
 0x4c9   :  { %2354 = vmatprep.subr.mxu1 %v2558_v34  ;;  %v1005_v44 = vmul.f32 %v2500_v42, %v2821_v7 }
 0x4ca   :  { %v1515_v43 = vpop.xlane.xlu0 %1514 }
 0x4cb   :  { %2505 = vrcp.f32 %v1515_v43  ;;  %2347 = vmatmul.mubr.msk.f32.vlgmr.msra.gmra.mxu1 %vm228_vm2, %v829_v41 }
 0x4cc   :  { %2355 = vmatpush3.msra.mxu1 %v1007_v20  ;;  %2356 = vmatprep.mubr.msk.f32.mxu1 %vm2559_vm1, %v2558_v34 }
 0x4cd   :  { %2364 = vmatprep.subr.mxu1 %v2558_v34 }
 0x4ce   :  { %v1347_v48 = vpop.permute.xlu0 %1346 }
 0x4cf   :  { %2357 = vmatmul.mubr.msk.f32.vlgmr.msra.gmra.mxu1 %vm228_vm2, %v1005_v44 }
 0x4d0   :  { %v2502_v45 = vpop.eup %2501  ;;  %2365 = vmatpush3.msra.mxu1 %v1175_v30  ;;  %2366 = vmatprep.mubr.msk.f32.mxu1 %vm2559_vm1, %v2558_v34 }
 0x4d1   :  { %2374 = vmatprep.subr.mxu1 %v2558_v34  ;;  %v1173_v46 = vmul.f32 %v2502_v45, %v2488_v14  ;;  %v2504_v47 = vpop.eup %2503 }
 0x4d2   :  { %v1345_v49 = vmul.f32 %v2504_v47, %v2825_v12 }
 0x4d3   :  { %2367 = vmatmul.mubr.msk.f32.vlgmr.msra.gmra.mxu1 %vm228_vm2, %v1173_v46 }
 0x4d4   :  { %2375 = vmatpush3.msra.mxu1 %v1347_v48  ;;  %2376 = vmatprep.mubr.msk.f32.mxu1 %vm2559_vm1, %v2558_v34  ;;  %v2214_v48 = vld [vmem:[%s3015_s8] ss:$0 sm:$0xff] }
 0x4d5   :  { %2384 = vmatprep.subr.mxu1 %v2558_v34 }
 0x4d7   :  { %2377 = vmatmul.mubr.msk.f32.vlgmr.msra.gmra.mxu1 %vm228_vm2, %v1345_v49 }
 0x4d8   :  { %v2506_v51 = vpop.eup %2505  ;;  %2385 = vmatpush3.msra.mxu1 %v1519_v50  ;;  %2386 = vmatprep.mubr.msk.f32.mxu1 %vm2559_vm1, %v2558_v34  ;;  %v2215_v50 = vld [vmem:[%s3016_s9] ss:$0 sm:$0xff] }
 0x4d9   :  { %v1517_v52 = vmul.f32 %v2506_v51, %v2830_v16  ;;  %v2211_v16 = vld [vmem:[%s3014_s7] ss:$0 sm:$0xff] }
 0x4db   :  { %2387 = vmatmul.mubr.msk.f32.vlgmr.msra.gmra.mxu1 %vm228_vm2, %v1517_v52 }
 0x552   :  { %v388_v53 = vpop.f32.mrf.mxu1 }
 0x553   :  { %392 = vst.msk [vmem:[#allocation2] sm:$0xff] %vm228_vm2, %v388_v53 }
 0x554   :  { %v2318_v54 = vpop.f32.mrf.mxu1 }
 0x556   :  { %v556_v55 = vpop.f32.mrf.mxu1 }
 0x557   :  { %561 = vrot.lane.b32.xlu0 %v556_v55, %s2572_s5 }
 0x558   :  { %v2328_v56 = vpop.f32.mrf.mxu1 }
 0x587   :  { %v729_v57 = vpop.f32.mrf.mxu1 }
 0x588   :  { %734 = vrot.lane.b32.xlu1 %v729_v57, %s2573_s4  ;;  %v1856_v57 = vld [vmem:[%s3019_s12 + $0x38] sm:$0xff] }
 0x589   :  { %v2338_v58 = vpop.f32.mrf.mxu1  ;;  %2411 = vmatprep.subr.mxu0 %v1856_v57 }
 0x58a   :  { %v1855_v58 = vld [vmem:[%s3019_s12 + $0x30] sm:$0xff] }
 0x58b   :  { %v902_v59 = vpop.f32.mrf.mxu1 }
 0x58c   :  { %907 = vrot.lane.b32.xlu1 %v902_v59, %s2574_s29  ;;  %v1854_v59 = vld [vmem:[%s3019_s12 + $0x28] sm:$0xff] }
 0x58d   :  { %v2348_v60 = vpop.f32.mrf.mxu1 }
 0x58e   :  { %v1853_v60 = vld [vmem:[%s3019_s12 + $0x20] sm:$0xff] }
 0x58f   :  { %v1078_v61 = vpop.f32.mrf.mxu1 }
 0x590   :  { %1082 = vst.msk [vmem:[#allocation2 + $0x8] sm:$0xff] %vm228_vm2, %v1078_v61  ;;  %v1852_v61 = vld [vmem:[%s3019_s12 + $0x18] sm:$0xff] }
 0x591   :  { %v2358_v0 = vpop.f32.mrf.mxu1 }
 0x592   :  { %v1849_v0 = vld [vmem:[%s3019_s12] sm:$0xff] }
 0x593   :  { %v1246_v2 = vpop.f32.mrf.mxu1 }
 0x594   :  { %1251 = vrot.lane.b32.xlu0 %v1246_v2, %s2572_s5 }
 0x595   :  { %v2368_v4 = vpop.f32.mrf.mxu1 }
 0x597   :  { %v1418_v5 = vpop.f32.mrf.mxu1 }
 0x598   :  { %1423 = vrot.lane.b32.xlu0 %v1418_v5, %s2573_s4 }
 0x599   :  { %v2378_v6 = vpop.f32.mrf.mxu1 }
 0x59b   :  { %v1590_v38 = vpop.f32.mrf.mxu1 }
 0x59c   :  { %1595 = vrot.lane.b32.xlu1 %v1590_v38, %s2574_s29 }
 0x59d   :  { %v2388_v7 = vpop.f32.mrf.mxu1 }
 0x5c9   :  { %v562_v8 = vpop.permute.xlu0 %561 }
 0x5ca   :  { %565 = vst.msk [vmem:[#allocation2] sm:$0xff] %vm564_vm5, %v562_v8 }
 0x5fa   :  { %v735_v9 = vpop.permute.xlu1 %734 }
 0x5fb   :  { %738 = vst.msk [vmem:[#allocation2] sm:$0xff] %vm737_vm6, %v735_v9 }
 0x5fe   :  { %v908_v10 = vpop.permute.xlu1 %907 }
 0x5ff   :  { %911 = vst.msk [vmem:[#allocation2] sm:$0xff] %vm910_vm7, %v908_v10 }
 0x606   :  { %v1252_v11 = vpop.permute.xlu0 %1251  ;;  %v1599_v12 = vld [vmem:[#allocation2] sm:$0xff] }
 0x607   :  { %1254 = vst.msk [vmem:[#allocation2 + $0x8] sm:$0xff] %vm564_vm5, %v1252_v11  ;;  %2397 = vmatprep.mubr.msk.f32.mxu0 %vm83_vm0, %v1599_v12 }
 0x60a   :  { %v1424_v13 = vpop.permute.xlu0 %1423 }
 0x60b   :  { %1426 = vst.msk [vmem:[#allocation2 + $0x8] sm:$0xff] %vm737_vm6, %v1424_v13 }
 0x60e   :  { %v1596_v14 = vpop.permute.xlu1 %1595 }
 0x60f   :  { %1598 = vst.msk [vmem:[#allocation2 + $0x8] sm:$0xff] %vm910_vm7, %v1596_v14 }
 0x616   :  { %v1600_v15 = vld [vmem:[#allocation2 + $0x8] sm:$0xff] }
 0x617   :  { %2398 = vmatmul.mubr.msk.f32.vlgmr.msra.gmra.mxu0 %vm83_vm0, %v1600_v15 }
 0x618   :  { %2412 = vmatpush3.msra.mxu0 %v1856_v57 }
 0x619   :  { %2413 = vmatprep.subr.mxu0 %v1855_v58 }
 0x61a   :  { %2414 = vmatpush3.msra.mxu0 %v1855_v58  ;;  %v2223_v58 = vld [vmem:[%s3022_s15] ss:$0 sm:$0xff] }
 0x61b   :  { %2415 = vmatprep.subr.mxu0 %v1854_v59 }
 0x61c   :  { %2416 = vmatpush3.msra.mxu0 %v1854_v59 }
 0x61d   :  { %2417 = vmatprep.subr.mxu0 %v1853_v60 }
 0x61e   :  { %2418 = vmatpush3.msra.mxu0 %v1853_v60 }
 0x61f   :  { %2419 = vmatprep.subr.mxu0 %v1852_v61 }
 0x620   :  { %2420 = vmatpush3.msra.mxu0 %v1852_v61 }
 0x621   :  { %2421 = vmatprep.subr.mxu0 %v1851_v62 }
 0x622   :  { %2422 = vmatpush3.msra.mxu0 %v1851_v62 }
 0x623   :  { %2423 = vmatprep.subr.mxu0 %v1850_v63 }
 0x624   :  { %2424 = vmatpush3.msra.mxu0 %v1850_v63 }
 0x625   :  { %2425 = vmatprep.subr.mxu0 %v1849_v0 }
 0x626   :  { %2426 = vmatpush3.msra.mxu0 %v1849_v0 }
 0x6d7   :  { %v2399_v17 = vpop.f32.mrf.mxu0 }
 0x6d8   :  { %v1690_v18 = vadd.f32 %v2399_v17, %v2211_v16 }
 0x6d9   :  { %v1684_v19 = vpop.f32.mrf.mxu0 }
 0x6da   :  { %v1685_v20 = vadd.f32 %v2211_v16, %v1684_v19  ;;  %v1694_v21 = vadd.f32 %v1690_v18, %v2716_v33 }
 0x6dc   :  { %v1700_v22 = vsel %vm83_vm0, %v1694_v21, 0.0  ;;  %v1693_v23 = vadd.f32 %v1685_v20, %v2712_v31  ;;  %v1742_v31 = vld [vmem:[%s3017_s10 + $0x18] sm:$0xff] }
 0x6dd   :  { %1701 = vadd.xlane.f32.xlu1 %v1700_v22  ;;  %2400 = vmatprep.subr.mxu1 %v1742_v31 }
 0x6de   :  { %v1697_v24 = vsel %vm83_vm0, %v1693_v23, 0.0  ;;  %2401 = vmatpush3.msra.mxu1 %v1742_v31 }
 0x6df   :  { %1698 = vadd.xlane.f32.xlu0 %v1697_v24  ;;  %2402 = vmatprep.subr.mxu1 %v1741_v36 }
 0x6e0   :  { %2403 = vmatpush3.msra.mxu1 %v1741_v36 }
 0x6e1   :  { %2404 = vmatprep.subr.mxu1 %v1740_v37 }
 0x6e2   :  { %2405 = vmatpush3.msra.mxu1 %v1740_v37 }
 0x6e3   :  { %2406 = vmatprep.subr.mxu1 %v1739_v40 }
 0x6e4   :  { %2407 = vmatpush3.msra.mxu1 %v1739_v40 }
 0x6e5   :  { %2430 = vmatprep.subr.mxu1 %v2558_v34 }
 0x766   :  { %v1702_v25 = vpop.xlane.xlu1 %1701 }
 0x767   :  { %v1704_v26 = vmul.f32 0.03125, %v1702_v25 }
 0x768   :  { %v1699_v39 = vpop.xlane.xlu0 %1698 }
 0x769   :  { %v1703_v27 = vmul.f32 0.03125, %v1699_v39  ;;  %v1706_v28 = vsub.f32 %v1694_v21, %v1704_v26 }
 0x76b   :  { %v1705_v29 = vsub.f32 %v1693_v23, %v1703_v27  ;;  %v1708_v35 = vmul.f32 %v1706_v28, %v1706_v28  ;;  %v2219_v23 = vld [vmem:[%s3020_s13] ss:$0 sm:$0xff] }
 0x76d   :  { %v1707_v30 = vmul.f32 %v1705_v29, %v1705_v29  ;;  %v1712_v33 = vsel %vm83_vm0, %v1708_v35, 0.0 }
 0x76f   :  { %v1709_v32 = vsel %vm83_vm0, %v1707_v30, 0.0 }
 0x770   :  { %1710 = vadd.xlane.f32.xlu0 %v1709_v32 }
 0x774   :  { %1713 = vadd.xlane.f32.xlu0 %v1712_v33 }
 0x7f9   :  { %v1711_v41 = vpop.xlane.xlu0 %1710 }
 0x7fa   :  { %v1715_v42 = vmul.f32 0.03125, %v1711_v41 }
 0x7fc   :  { %v1717_v43 = vadd.f32 1e-12, %v1715_v42 }
 0x7fd   :  { %v1714_v44 = vpop.xlane.xlu0 %1713 }
 0x7fe   :  { %2507 = vrsqrt.f32 %v1717_v43  ;;  %v1716_v45 = vmul.f32 0.03125, %v1714_v44  ;;  %v1999_v44 = vld [vmem:[%s3023_s16 + $0x18] sm:$0xff] }
 0x800   :  { %v1718_v46 = vadd.f32 1e-12, %v1716_v45  ;;  %v1998_v45 = vld [vmem:[%s3023_s16 + $0x10] sm:$0xff] }
 0x802   :  { %2509 = vrsqrt.f32 %v1718_v46  ;;  %v1997_v46 = vld [vmem:[%s3023_s16 + $0x8] sm:$0xff] }
 0x80b   :  { %v2508_v47 = vpop.eup %2507 }
 0x80c   :  { %v1721_v49 = vmul.f32 %v2508_v47, %v1705_v29  ;;  %v1996_v47 = vld [vmem:[%s3023_s16] sm:$0xff] }
 0x80e   :  { %v1729_v51 = vmul.f32 %v2214_v48, %v1721_v49 }
 0x80f   :  { %v2510_v52 = vpop.eup %2509 }
 0x810   :  { %v1722_v53 = vmul.f32 %v2510_v52, %v1706_v28  ;;  %v2915_v54 = vadd.f32 %v2215_v50, %v1729_v51 }
 0x812   :  { %v1730_v55 = vmul.f32 %v2214_v48, %v1722_v53  ;;  %2408 = vmatprep.mubr.msk.f32.mxu1 %vm83_vm0, %v2915_v54 }
 0x814   :  { %v1738_v56 = vadd.f32 %v2215_v50, %v1730_v55  ;;  %v2222_v55 = vld [vmem:[%s3021_s14] ss:$0 sm:$0xff] }
 0x816   :  { %2409 = vmatmul.mubr.msk.f32.vlgmr.msra.gmra.mxu1 %vm83_vm0, %v1738_v56 }
 0x817   :  { %2438 = vmatprep.mubr.msk.f32.mxu1 %vm2559_vm1, %v2558_v34  ;;  %2431 = vmatpush3.msra.mxu1 %v1999_v44 }
 0x818   :  { %2432 = vmatprep.subr.mxu1 %v2558_v34 }
 0x819   :  { %2433 = vmatpush3.msra.mxu1 %v1998_v45 }
 0x81a   :  { %2434 = vmatprep.subr.mxu1 %v2558_v34 }
 0x81b   :  { %2435 = vmatpush3.msra.mxu1 %v1997_v46 }
 0x81c   :  { %2436 = vmatprep.subr.mxu1 %v2558_v34 }
 0x81d   :  { %2437 = vmatpush3.msra.mxu1 %v1996_v47 }
 0x81e   :  { %2441 = vmatprep.subr.mxu1 %v2558_v34 }
 0x8d6   :  { %v2410_v2 = vpop.f32.mrf.mxu1 }
 0x8d7   :  { %v1828_v3 = vadd.f32 %v2410_v2, %v2216_v1  ;;  %v2083_v2 = vld [vmem:[%s3025_s18 + $0x10] sm:$0xff] }
 0x8d8   :  { %v1822_v4 = vpop.f32.mrf.mxu1 }
 0x8d9   :  { %v1832_v5 = vmul.f32 %v1828_v3, %v1828_v3  ;;  %v1823_v6 = vadd.f32 %v2216_v1, %v1822_v4  ;;  %v2084_v1 = vld [vmem:[%s3025_s18 + $0x18] sm:$0xff]  ;;  %v2081_v4 = vld [vmem:[%s3025_s18] sm:$0xff] }
 0x8db   :  { %v1834_v38 = vmul.f32 %v1832_v5, %v1828_v3  ;;  %v1831_v7 = vmul.f32 %v1823_v6, %v1823_v6  ;;  %v2224_v5 = vld [vmem:[%s3024_s17] ss:$0 sm:$0xff] }
 0x8dd   :  { %v1836_v8 = vmul.f32 0.044715, %v1834_v38  ;;  %v1833_v9 = vmul.f32 %v1831_v7, %v1823_v6 }
 0x8df   :  { %v1838_v10 = vadd.f32 %v1836_v8, %v1828_v3  ;;  %v1835_v11 = vmul.f32 0.044715, %v1833_v9  ;;  %v2226_v9 = vld [vmem:[%s3026_s19] ss:$0 sm:$0xff] }
 0x8e1   :  { %v1840_v12 = vmul.f32 0.7978846, %v1838_v10  ;;  %v1837_v13 = vadd.f32 %v1835_v11, %v1823_v6 }
 0x8e3   :  { %2511 = vtanh.f32 %v1840_v12  ;;  %v1839_v14 = vmul.f32 0.7978846, %v1837_v13 }
 0x8e5   :  { %2513 = vtanh.f32 %v1839_v14 }
 0x8f0   :  { %v2512_v15 = vpop.eup %2511 }
 0x8f1   :  { %v1844_v16 = vadd.f32 1.0, %v2512_v15 }
 0x8f2   :  { %v2514_v17 = vpop.eup %2513 }
 0x8f3   :  { %v1843_v18 = vadd.f32 1.0, %v2514_v17  ;;  %v1846_v19 = vmul.f32 0.5, %v1844_v16 }
 0x8f5   :  { %v1845_v20 = vmul.f32 0.5, %v1843_v18  ;;  %v1848_v22 = vmul.f32 %v1846_v19, %v1828_v3  ;;  %v2082_v3 = vld [vmem:[%s3025_s18 + $0x8] sm:$0xff]  ;;  %s2575_s18 = smov [#allocation7]  }
 0x8f6   :  { %s2172_s30 = sshll.u32 %s2575_s18, 4  ;;  %s2173_s30 = int_to_ptr.vmem [resolvable:$true] %s2172_s30 }
 0x8f7   :  { %v1847_v21 = vmul.f32 %v1845_v20, %v1823_v6  ;;  %s2533_s11 = scalar_lea.vmem %s2173_s30, 32  ;;  %p2538_p6 = scmp.lt.s32.totalorder %s2173_s30, %s2173_s30 }
 0x8f8   :  { %p2534_p5 = scmp.ne.s32.totalorder %s2173_s30, %s2533_s11  ;;  %p2539_p7 = scmp.lt.s32.totalorder %s2533_s11, %s2533_s11 }
 0x8f9   :  { %2427 = vmatprep.mubr.msk.f32.mxu0 %vm1864_vm8, %v1847_v21 }
 0x8fa   :  { %2428 = vmatmul.mubr.msk.f32.vlgmr.msra.gmra.mxu0 %vm1864_vm8, %v1848_v22  ;;  %p2540_p8 = por %p2539_p7, %p2538_p6 }
 0x8fc   :  { %p2541_p9 = pnand %p2540_p8, %p2534_p5 }
 0x9ba   :  { %v2429_v24 = vpop.f32.mrf.mxu0 }
 0x9bb   :  { %v1943_v25 = vadd.f32 %v2429_v24, %v2219_v23 }
 0x9bc   :  { %v1937_v26 = vpop.f32.mrf.mxu0 }
 0x9bd   :  { %v1938_v39 = vadd.f32 %v2219_v23, %v1937_v26  ;;  %v1947_v27 = vadd.f32 %v1943_v25, %v1738_v56 }
 0x9bf   :  { %v1953_v28 = vsel %vm83_vm0, %v1947_v27, 0.0  ;;  %v1946_v29 = vadd.f32 %v1938_v39, %v2915_v54 }
 0x9c0   :  { %1954 = vadd.xlane.f32.xlu1 %v1953_v28 }
 0x9c1   :  { %v1950_v30 = vsel %vm83_vm0, %v1946_v29, 0.0 }
 0x9c2   :  { %1951 = vadd.xlane.f32.xlu0 %v1950_v30 }
 0xa49   :  { %v1955_v32 = vpop.xlane.xlu1 %1954 }
 0xa4a   :  { %v1957_v35 = vmul.f32 0.03125, %v1955_v32 }
 0xa4b   :  { %v1952_v33 = vpop.xlane.xlu0 %1951 }
 0xa4c   :  { %v1959_v31 = vsub.f32 %v1947_v27, %v1957_v35  ;;  %v1956_v36 = vmul.f32 0.03125, %v1952_v33 }
 0xa4e   :  { %v1958_v37 = vsub.f32 %v1946_v29, %v1956_v36  ;;  %v1961_v40 = vmul.f32 %v1959_v31, %v1959_v31 }
 0xa50   :  { %v1965_v41 = vsel %vm83_vm0, %v1961_v40, 0.0  ;;  %v1960_v42 = vmul.f32 %v1958_v37, %v1958_v37 }
 0xa51   :  { %1966 = vadd.xlane.f32.xlu1 %v1965_v41 }
 0xa52   :  { %v1962_v43 = vsel %vm83_vm0, %v1960_v42, 0.0 }
 0xa53   :  { %1963 = vadd.xlane.f32.xlu0 %v1962_v43 }
 0xada   :  { %v1967_v48 = vpop.xlane.xlu1 %1966 }
 0xadb   :  { %v1969_v49 = vmul.f32 0.03125, %v1967_v48 }
 0xadc   :  { %v1964_v50 = vpop.xlane.xlu0 %1963 }
 0xadd   :  { %v1971_v51 = vadd.f32 1e-12, %v1969_v49  ;;  %v1968_v52 = vmul.f32 0.03125, %v1964_v50 }
 0xadf   :  { %2515 = vrsqrt.f32 %v1971_v51  ;;  %v1970_v53 = vadd.f32 1e-12, %v1968_v52 }
 0xae1   :  { %2517 = vrsqrt.f32 %v1970_v53 }
 0xaec   :  { %v2516_v54 = vpop.eup %2515 }
 0xaed   :  { %v1975_v56 = vmul.f32 %v2516_v54, %v1959_v31 }
 0xaee   :  { %v2518_v57 = vpop.eup %2517 }
 0xaef   :  { %v1983_v59 = vmul.f32 %v2222_v55, %v1975_v56  ;;  %v1974_v60 = vmul.f32 %v2518_v57, %v1958_v37 }
 0xaf1   :  { %v1991_v61 = vadd.f32 %v2223_v58, %v1983_v59  ;;  %v1982_v62 = vmul.f32 %v2222_v55, %v1974_v60 }
 0xaf3   :  { %1994 = vst.msk [vmem:[#allocation3 + $0x1] sm:$0x1] %vm1992_vm9, %v1991_v61  ;;  %v1990_v63 = vadd.f32 %v2223_v58, %v1982_v62 }
 0xaf5   :  { %1993 = vst.msk [vmem:[#allocation3] sm:$0x1] %vm1992_vm9, %v1990_v63 }
 0xafc   :  { %v1995_v0 = vld [vmem:[#allocation3] sm:$0x3] }
 0xafd   :  { %2439 = vmatmul.mubr.msk.f32.vlgmr.msra.gmra.mxu1 %vm83_vm0, %v1995_v0 }
 0xafe   :  { %2449 = vmatprep.mubr.msk.f32.mxu1 %vm2559_vm1, %v2558_v34  ;;  %2442 = vmatpush3.msra.mxu1 %v2084_v1 }
 0xaff   :  { %2443 = vmatprep.subr.mxu1 %v2558_v34 }
 0xb00   :  { %2444 = vmatpush3.msra.mxu1 %v2083_v2 }
 0xb01   :  { %2445 = vmatprep.subr.mxu1 %v2558_v34 }
 0xb02   :  { %2446 = vmatpush3.msra.mxu1 %v2082_v3 }
 0xb03   :  { %2447 = vmatprep.subr.mxu1 %v2558_v34 }
 0xb04   :  { %2448 = vmatpush3.msra.mxu1 %v2081_v4 }
 0xbbd   :  { %v2076_v6 = vpop.f32.mrf.mxu1 }
 0xbbe   :  { %v2077_v38 = vadd.f32 %v2224_v5, %v2076_v6 }
 0xbbf   :  { %v2440_v7 = vpop.f32.mrf.mxu1 }
 0xbc0   :  { %2519 = vtanh.f32 %v2077_v38 }
 0xbcd   :  { %v2520_v8 = vpop.eup %2519 }
 0xbce   :  { %2450 = vmatmul.mubr.msk.f32.vlgmr.msra.gmra.mxu1 %vm83_vm0, %v2520_v8 }
 0xc8e   :  { %v2161_v10 = vpop.f32.mrf.mxu1 }
 0xc8f   :  { %v2162_v34 = vadd.f32 %v2226_v9, %v2161_v10 }
 0xc90   :  { %v2451_v11 = vpop.f32.mrf.mxu1 }
 0xc91   :  { %2165 = vst [vmem:[#allocation7] sm:$0x3] %v2162_v34 }
 0xc92   :  { %2544 = shalt.err (!%p2541_p9)
}
 0xc93   :  { %2175 = dma.vmem_to_hbm [thread:$0]  %s2173_s30, 32, %s3027_s20, [#allocation5]  }
 0xc94   :  { %2555 = dma.done.wait [#allocation5], 32  }
 0xc95   :  { %2556 = vsyncadd [#allocation5], 4294967264 }
 0xc96   :  { %2179 = vsyncpa [#allocation5], 1 }
 0xc97   :  { %2180 = vsyncpa [#allocation6], 1 }

</bundles_post_ra>
